<compile_context>
chip_gen: v7x
topology: tpu7x:2x2x1
jax: 0.10.0
libtpu: 0.0.40
codegen_flags: <defaults>
</compile_context>

<pallas_src>
import math

import jax
import jax.numpy as jnp
from jax import lax
from jax.experimental import pallas as pl
from jax.experimental.pallas import tpu as pltpu

ELEM_LIST = ['C', 'N', 'O', 'S', 'F', 'Si', 'P', 'Cl', 'Br', 'Mg', 'Na', 'Ca',
             'Fe', 'Al', 'I', 'B', 'K', 'Se', 'Zn', 'H', 'Cu', 'Mn', 'unknown']
ATOM_FDIM = len(ELEM_LIST) + 6 + 5 + 1          # 35
LORENTZ_IN_FEAT = ATOM_FDIM + 1                 # 36 (time + atom features)
LANE = 128                                      # lane-dense padded width


def _round_up(x, m):
    return (x + m - 1) // m * m


# ----------------------------------------------------------------------------
# Fused forward kernel (single invocation, everything resident in VMEM)
# ----------------------------------------------------------------------------
def _fused_forward_kernel(scales_ref,        # SMEM [depth+1]           f32
                          gf_ref,            # VMEM [Ng, P]  col0=0 time, 1..35 atom feats, rest 0
                          tf_ref,            # VMEM [Nt, P]  tree Lorentz points, zero padded
                          adj_ref,           # VMEM [N, N]
                          scope_ref,         # VMEM [B, N]   per-scope 1/len averaging rows
                          hw_ref, hb_ref,    # VMEM [P, P], [1, P]        (Hlinear, zero padded)
                          lw_ref, lb_ref,    # VMEM [depth, P, P], [depth, 1, P]
                          out_ref,           # VMEM [B, P]
                          h_ref):            # VMEM scratch [N, P]
    p_dim = out_ref.shape[1]
    depth = lw_ref.shape[0]                  # trace-time constant -> static unroll
    nt = tf_ref.shape[0]

    # Time-column mask: built once, used ONLY for the final column writes
    # (never inside reductions).
    is_time = lax.broadcasted_iota(jnp.int32, (1, p_dim), 1) == 0

    def lorentz_linear(x, w, b, scale, relu):
        if relu:
            x = jnp.maximum(x, 0.0)
        y = jnp.dot(x, w, preferred_element_type=jnp.float32) + b
        y0 = y[:, 0:1]                                            # static lane-0 slice
        sig = pl.reciprocal(1.0 + jnp.exp(-y0), approx=True)      # sigmoid via EUP
        time = sig * scale + 1.1
        space_sq = jnp.sum(y * y, axis=-1, keepdims=True) - y0 * y0
        space_sq = jnp.maximum(space_sq, 1e-8)
        scl = jnp.sqrt((time * time - 1.0) * pl.reciprocal(space_sq, approx=True))
        return jnp.where(is_time, time, y * scl)

    def lorentz_agg(a, h):
        s = jnp.dot(a, h, preferred_element_type=jnp.float32)
        s0 = s[:, 0:1]
        inner = jnp.sum(s * s, axis=-1, keepdims=True) - 2.0 * s0 * s0
        denom = jnp.sqrt(jnp.maximum(jnp.abs(inner), 1e-8))
        return s * pl.reciprocal(denom, approx=True)

    # ---- Lorentz expmap0 (+ hyperboloid projection) on graph atom features ----
    u = gf_ref[...]                                    # u[:, 0] == 0 (time)
    # NOTE: exp(nomin) overflows f32 only for feature norms > ~88; one-hot atom
    # features have norm <= ~sqrt(6), same behavior as the PyTorch reference.
    inner = jnp.sum(u * u, axis=-1, keepdims=True)     # u0 == 0 -> Lorentz == Euclid
    nomin = jnp.sqrt(jnp.maximum(inner, 1e-8))
    e_p = jnp.exp(nomin)
    e_m = pl.reciprocal(e_p, approx=True)              # exp(-nomin)
    sinh_n = 0.5 * (e_p - e_m)
    r = sinh_n * u * pl.reciprocal(nomin, approx=True)  # space part; col 0 stays 0
    space_sq = jnp.sum(r * r, axis=-1, keepdims=True)
    time = jnp.sqrt(1.0 + space_sq)                    # projx: exact manifold time
    gf = jnp.where(is_time, time, r)

    # ---- Hlinear (no nonlin) ----
    gf = lorentz_linear(gf, hw_ref[...], hb_ref[...], scales_ref[0], relu=False)

    # ---- x = concat([tree_features, graph_features], axis=0), kept in VMEM ----
    h_ref[0:nt, :] = tf_ref[...]
    h_ref[nt:, :] = gf
    adj = adj_ref[...]                                 # resident once, reused per layer

    # ---- LorentzGraphConvolution stack (layer 0: no nonlin), statically unrolled ----
    h = lorentz_agg(adj, lorentz_linear(h_ref[...], lw_ref[0], lb_ref[0],
                                        scales_ref[1], relu=False))
    for i in range(1, depth):
        h = lorentz_agg(adj, lorentz_linear(h, lw_ref[i], lb_ref[i],
                                            scales_ref[i + 1], relu=True))

    # ---- per-scope Lorentz mid_point (mean + Lorentz normalization) ----
    out_ref[...] = lorentz_agg(scope_ref[...], h)


# ----------------------------------------------------------------------------
# Wrapper: lane-dense padding + single pallas_call
# ----------------------------------------------------------------------------
def _pad2(x, rows, cols):
    out = jnp.zeros((rows, cols), jnp.float32)
    return out.at[:x.shape[0], :x.shape[1]].set(x.astype(jnp.float32))


@jax.jit
def hyperbolic_jtmpn_forward(adj, graph_features, tree_features, scope_w, params):
    """adj: [N, N]; graph_features: [Ng, ATOM_FDIM]; tree_features: [Nt, H];
    scope_w: [B, N] per-molecule averaging matrix (1/len inside each scope)."""
    h_dim = tree_features.shape[1]
    ng, f_dim = graph_features.shape
    nt = tree_features.shape[0]
    n = adj.shape[0]
    b = scope_w.shape[0]
    p_dim = _round_up(max(h_dim, f_dim + 1), LANE)     # lane-dense padded width

    # Zero-padded, lane-dense operands (zero columns never affect the Lorentz
    # inner products or the matmuls since the padded weight rows/cols are 0).
    gf = jnp.zeros((ng, p_dim), jnp.float32).at[:, 1:1 + f_dim].set(
        graph_features.astype(jnp.float32))            # col 0 = zero time coord
    tf = _pad2(tree_features, nt, p_dim)
    hw = _pad2(params['hlinear']['w'], p_dim, p_dim)
    hb = _pad2(params['hlinear']['b'], 1, p_dim)
    lw = jnp.stack([_pad2(l['w'], p_dim, p_dim) for l in params['layers']])
    lb = jnp.stack([_pad2(l['b'], 1, p_dim) for l in params['layers']])
    scales = jnp.concatenate([params['hlinear']['scale']]
                             + [l['scale'] for l in params['layers']])

    vmem = pl.BlockSpec(memory_space=pltpu.MemorySpace.VMEM)
    smem = pl.BlockSpec(memory_space=pltpu.MemorySpace.SMEM)

    # TODO(synk): for large candidate batches, add a parallel grid axis over
    # molecule blocks (megacore) and cast matmul operands to bf16 with f32
    # accumulation; at the demo sizes everything fits one invocation.
    out = pl.pallas_call(
        _fused_forward_kernel,
        out_shape=jax.ShapeDtypeStruct((b, p_dim), jnp.float32),
        in_specs=[smem] + [vmem] * 8,
        out_specs=vmem,
        scratch_shapes=[pltpu.VMEM((n, p_dim), jnp.float32)],
    )(scales, gf, tf, adj.astype(jnp.float32), scope_w.astype(jnp.float32),
      hw, hb, lw, lb)
    return out[:, :h_dim]


# ----------------------------------------------------------------------------
# Parameter init (matches LorentzLinear's uniform(-1/sqrt(fout), 1/sqrt(fout)))
# ----------------------------------------------------------------------------
def init_lorentz_linear_params(key, fin, fout):
    kw, kb = jax.random.split(key)
    stdv = 1.0 / math.sqrt(fout)
    return dict(
        w=jax.random.uniform(kw, (fin, fout), jnp.float32, -stdv, stdv),
        b=jax.random.uniform(kb, (1, fout), jnp.float32, -stdv, stdv),
        scale=jnp.array([10.0], jnp.float32),   # LorentzLinear scale parameter
    )


def init_params(key, hidden_size, depth):
    keys = jax.random.split(key, depth + 1)
    return dict(
        hlinear=init_lorentz_linear_params(keys[0], LORENTZ_IN_FEAT, hidden_size),
        layers=[init_lorentz_linear_params(keys[i + 1], hidden_size, hidden_size)
                for i in range(depth)],
    )


# ----------------------------------------------------------------------------
# Demo
# ----------------------------------------------------------------------------
if __name__ == "__main__":
    HIDDEN = 32       # args.dim
    DEPTH = 2         # args.num_layers_graph
    NT = 8            # tree nodes
    NG = 24           # candidate-graph atoms
    N = NT + NG
    BATCH = 2

    key = jax.random.PRNGKey(0)
    k_gf, k_tf, k_adj, k_par = jax.random.split(key, 4)

    # atom features: sparse 0/1 pattern like one-hot encodings
    graph_features = (jax.random.uniform(k_gf, (NG, ATOM_FDIM)) < 0.15
                      ).astype(jnp.float32)

    # tree features: points on the Lorentz hyperboloid of dim HIDDEN
    ts = 0.1 * jax.random.normal(k_tf, (NT, HIDDEN - 1), jnp.float32)
    t0 = jnp.sqrt(1.0 + jnp.sum(ts * ts, axis=-1, keepdims=True))
    tree_features = jnp.concatenate([t0, ts], axis=1)

    # symmetric normalized adjacency with self loops (what DataProcess produces)
    raw = (jax.random.uniform(k_adj, (N, N)) < 0.2).astype(jnp.float32)
    a = jnp.minimum(jnp.maximum(raw, raw.T) + jnp.eye(N, dtype=jnp.float32), 1.0)
    d_inv_sqrt = 1.0 / jnp.sqrt(jnp.sum(a, axis=1))
    adj = a * d_inv_sqrt[:, None] * d_inv_sqrt[None, :]

    # scope = [(NT, 12), (NT+12, 12)] expressed as a [B, N] averaging matrix
    scope = [(NT, 12), (NT + 12, 12)]
    scope_w = jnp.zeros((BATCH, N), jnp.float32)
    for bi, (st, le) in enumerate(scope):
        scope_w = scope_w.at[bi, st:st + le].set(1.0 / le)

    params = init_params(k_par, HIDDEN, DEPTH)

    mol_vecs = hyperbolic_jtmpn_forward(adj, graph_features, tree_features,
                                        scope_w, params)
    mol_vecs = jax.block_until_ready(mol_vecs)
    assert mol_vecs.shape == (BATCH, HIDDEN)
    assert bool(jnp.all(jnp.isfinite(mol_vecs)))
    print("KERNEL_OK")
</pallas_src>

<mosaic_0001>
module attributes {stable_mosaic.version = 11 : i64} {
  func.func @_fused_forward_kernel(%arg0: memref<3xf32, #tpu.memory_space<smem>>, %arg1: memref<24x128xf32, #tpu.memory_space<vmem>>, %arg2: memref<8x128xf32, #tpu.memory_space<vmem>>, %arg3: memref<32x32xf32, #tpu.memory_space<vmem>>, %arg4: memref<2x32xf32, #tpu.memory_space<vmem>>, %arg5: memref<128x128xf32, #tpu.memory_space<vmem>>, %arg6: memref<1x128xf32, #tpu.memory_space<vmem>>, %arg7: memref<2x128x128xf32, #tpu.memory_space<vmem>>, %arg8: memref<2x1x128xf32, #tpu.memory_space<vmem>>, %arg9: memref<2x128xf32, #tpu.memory_space<vmem>>, %arg10: memref<32x128xf32, #tpu.memory_space<vmem>>) attributes {dimension_semantics = [], scalar_prefetch = 0 : i64, scratch_operands = 1 : i64, tpu.core_type = #tpu.core_type<tc>} {
    %0 = tpu.iota {dimensions = array<i32: 1>} : vector<1x128xi32>
    %c0_i32 = arith.constant 0 : i32
    %1 = vector.broadcast %c0_i32 : i32 to vector<1x128xi32>
    %2 = arith.cmpi eq, %0, %1 : vector<1x128xi32>
    %c0 = arith.constant 0 : index
    %c0_0 = arith.constant 0 : index
    %3 = vector.load %arg1[%c0, %c0_0] : memref<24x128xf32, #tpu.memory_space<vmem>>, vector<24x128xf32>
    %4 = arith.mulf %3, %3 : vector<24x128xf32>
    %cst = arith.constant dense<0.000000e+00> : vector<24xf32>
    %5 = vector.multi_reduction <add>, %4, %cst [1] : vector<24x128xf32> to vector<24xf32>
    %6 = vector.shape_cast %5 : vector<24xf32> to vector<24x1xf32>
    %cst_1 = arith.constant 9.99999993E-9 : f32
    %7 = vector.broadcast %cst_1 : f32 to vector<24x1xf32>
    %8 = arith.maximumf %6, %7 : vector<24x1xf32>
    %9 = math.sqrt %8 : vector<24x1xf32>
    %10 = math.exp %9 : vector<24x1xf32>
    %11 = tpu.reciprocal %10 {approx = true} : vector<24x1xf32> -> vector<24x1xf32>
    %12 = arith.subf %10, %11 : vector<24x1xf32>
    %cst_2 = arith.constant 5.000000e-01 : f32
    %13 = vector.broadcast %cst_2 : f32 to vector<24x1xf32>
    %14 = arith.mulf %13, %12 : vector<24x1xf32>
    %15 = vector.broadcast %14 : vector<24x1xf32> to vector<24x128xf32>
    %16 = arith.mulf %15, %3 : vector<24x128xf32>
    %17 = tpu.reciprocal %9 {approx = true} : vector<24x1xf32> -> vector<24x1xf32>
    %18 = vector.broadcast %17 : vector<24x1xf32> to vector<24x128xf32>
    %19 = arith.mulf %16, %18 : vector<24x128xf32>
    %20 = arith.mulf %19, %19 : vector<24x128xf32>
    %cst_3 = arith.constant dense<0.000000e+00> : vector<24xf32>
    %21 = vector.multi_reduction <add>, %20, %cst_3 [1] : vector<24x128xf32> to vector<24xf32>
    %22 = vector.shape_cast %21 : vector<24xf32> to vector<24x1xf32>
    %cst_4 = arith.constant 1.000000e+00 : f32
    %23 = vector.broadcast %cst_4 : f32 to vector<24x1xf32>
    %24 = arith.addf %23, %22 : vector<24x1xf32>
    %25 = math.sqrt %24 : vector<24x1xf32>
    %26 = vector.shape_cast %2 : vector<1x128xi1> to vector<1x128xi1>
    %27 = vector.broadcast %26 : vector<1x128xi1> to vector<24x128xi1>
    %28 = vector.shape_cast %25 : vector<24x1xf32> to vector<24x1xf32>
    %29 = vector.broadcast %28 : vector<24x1xf32> to vector<24x128xf32>
    %30 = arith.select %27, %29, %19 : vector<24x128xi1>, vector<24x128xf32>
    %c0_5 = arith.constant 0 : index
    %c0_6 = arith.constant 0 : index
    %31 = vector.load %arg5[%c0_5, %c0_6] : memref<128x128xf32, #tpu.memory_space<vmem>>, vector<128x128xf32>
    %c0_7 = arith.constant 0 : index
    %c0_8 = arith.constant 0 : index
    %32 = vector.load %arg6[%c0_7, %c0_8] : memref<1x128xf32, #tpu.memory_space<vmem>>, vector<1x128xf32>
    %c0_9 = arith.constant 0 : index
    %33 = memref.load %arg0[%c0_9] : memref<3xf32, #tpu.memory_space<smem>>
    %cst_10 = arith.constant dense<0.000000e+00> : vector<24x128xf32>
    %34 = tpu.matmul %30, %31, %cst_10 {dimension_numbers = #tpu.dot_dimension_numbers<[1], [0], [0], [1], [0, 0, 1, 1], [], []>} : vector<24x128xf32>, vector<128x128xf32>, vector<24x128xf32> -> vector<24x128xf32>
    %35 = vector.broadcast %32 : vector<1x128xf32> to vector<24x128xf32>
    %36 = arith.addf %34, %35 : vector<24x128xf32>
    %37 = vector.extract_strided_slice %36 {offsets = [0, 0], sizes = [24, 1], strides = [1, 1]} : vector<24x128xf32> to vector<24x1xf32>
    %cst_11 = arith.constant 0.000000e+00 : f32
    %38 = vector.broadcast %cst_11 : f32 to vector<24x1xf32>
    %39 = arith.subf %38, %37 : vector<24x1xf32>
    %40 = math.exp %39 : vector<24x1xf32>
    %cst_12 = arith.constant 1.000000e+00 : f32
    %41 = vector.broadcast %cst_12 : f32 to vector<24x1xf32>
    %42 = arith.addf %41, %40 : vector<24x1xf32>
    %43 = tpu.reciprocal %42 {approx = true} : vector<24x1xf32> -> vector<24x1xf32>
    %44 = vector.broadcast %33 : f32 to vector<24x1xf32>
    %45 = arith.mulf %43, %44 : vector<24x1xf32>
    %cst_13 = arith.constant 1.100000e+00 : f32
    %46 = vector.broadcast %cst_13 : f32 to vector<24x1xf32>
    %47 = arith.addf %45, %46 : vector<24x1xf32>
    %48 = arith.mulf %36, %36 : vector<24x128xf32>
    %cst_14 = arith.constant dense<0.000000e+00> : vector<24xf32>
    %49 = vector.multi_reduction <add>, %48, %cst_14 [1] : vector<24x128xf32> to vector<24xf32>
    %50 = vector.shape_cast %49 : vector<24xf32> to vector<24x1xf32>
    %51 = arith.mulf %37, %37 : vector<24x1xf32>
    %52 = arith.subf %50, %51 : vector<24x1xf32>
    %cst_15 = arith.constant 9.99999993E-9 : f32
    %53 = vector.broadcast %cst_15 : f32 to vector<24x1xf32>
    %54 = arith.maximumf %52, %53 : vector<24x1xf32>
    %55 = arith.mulf %47, %47 : vector<24x1xf32>
    %cst_16 = arith.constant 1.000000e+00 : f32
    %56 = vector.broadcast %cst_16 : f32 to vector<24x1xf32>
    %57 = arith.subf %55, %56 : vector<24x1xf32>
    %58 = tpu.reciprocal %54 {approx = true} : vector<24x1xf32> -> vector<24x1xf32>
    %59 = arith.mulf %57, %58 : vector<24x1xf32>
    %60 = math.sqrt %59 : vector<24x1xf32>
    %61 = vector.broadcast %60 : vector<24x1xf32> to vector<24x128xf32>
    %62 = arith.mulf %36, %61 : vector<24x128xf32>
    %63 = vector.shape_cast %2 : vector<1x128xi1> to vector<1x128xi1>
    %64 = vector.broadcast %63 : vector<1x128xi1> to vector<24x128xi1>
    %65 = vector.shape_cast %47 : vector<24x1xf32> to vector<24x1xf32>
    %66 = vector.broadcast %65 : vector<24x1xf32> to vector<24x128xf32>
    %67 = arith.select %64, %66, %62 : vector<24x128xi1>, vector<24x128xf32>
    %c0_17 = arith.constant 0 : index
    %c0_18 = arith.constant 0 : index
    %68 = vector.load %arg2[%c0_17, %c0_18] : memref<8x128xf32, #tpu.memory_space<vmem>>, vector<8x128xf32>
    %c0_19 = arith.constant 0 : index
    %c0_20 = arith.constant 0 : index
    %69 = vector.load %arg10[%c0_19, %c0_20] : memref<32x128xf32, #tpu.memory_space<vmem>>, vector<8x128xf32>
    tpu.vector_store %arg10[%c0_19, %c0_20], %68 {strides = array<i32>} : memref<32x128xf32, #tpu.memory_space<vmem>>, vector<8x128xf32>,
    %c8 = arith.constant 8 : index
    %c0_21 = arith.constant 0 : index
    %70 = vector.load %arg10[%c8, %c0_21] : memref<32x128xf32, #tpu.memory_space<vmem>>, vector<24x128xf32>
    tpu.vector_store %arg10[%c8, %c0_21], %67 {strides = array<i32>} : memref<32x128xf32, #tpu.memory_space<vmem>>, vector<24x128xf32>,
    %c0_22 = arith.constant 0 : index
    %c0_23 = arith.constant 0 : index
    %71 = vector.load %arg3[%c0_22, %c0_23] : memref<32x32xf32, #tpu.memory_space<vmem>>, vector<32x32xf32>
    %c0_24 = arith.constant 0 : index
    %c0_25 = arith.constant 0 : index
    %72 = vector.load %arg10[%c0_24, %c0_25] : memref<32x128xf32, #tpu.memory_space<vmem>>, vector<32x128xf32>
    %c0_26 = arith.constant 0 : index
    %c0_27 = arith.constant 0 : index
    %c0_28 = arith.constant 0 : index
    %73 = vector.load %arg7[%c0_26, %c0_27, %c0_28] : memref<2x128x128xf32, #tpu.memory_space<vmem>>, vector<1x128x128xf32>
    %74 = vector.shape_cast %73 : vector<1x128x128xf32> to vector<128x128xf32>
    %c0_29 = arith.constant 0 : index
    %c0_30 = arith.constant 0 : index
    %c0_31 = arith.constant 0 : index
    %75 = vector.load %arg8[%c0_29, %c0_30, %c0_31] : memref<2x1x128xf32, #tpu.memory_space<vmem>>, vector<1x1x128xf32>
    %76 = vector.shape_cast %75 : vector<1x1x128xf32> to vector<1x128xf32>
    %c1 = arith.constant 1 : index
    %77 = memref.load %arg0[%c1] : memref<3xf32, #tpu.memory_space<smem>>
    %cst_32 = arith.constant dense<0.000000e+00> : vector<32x128xf32>
    %78 = tpu.matmul %72, %74, %cst_32 {dimension_numbers = #tpu.dot_dimension_numbers<[1], [0], [0], [1], [0, 0, 1, 1], [], []>} : vector<32x128xf32>, vector<128x128xf32>, vector<32x128xf32> -> vector<32x128xf32>
    %79 = vector.broadcast %76 : vector<1x128xf32> to vector<32x128xf32>
    %80 = arith.addf %78, %79 : vector<32x128xf32>
    %81 = vector.extract_strided_slice %80 {offsets = [0, 0], sizes = [32, 1], strides = [1, 1]} : vector<32x128xf32> to vector<32x1xf32>
    %cst_33 = arith.constant 0.000000e+00 : f32
    %82 = vector.broadcast %cst_33 : f32 to vector<32x1xf32>
    %83 = arith.subf %82, %81 : vector<32x1xf32>
    %84 = math.exp %83 : vector<32x1xf32>
    %cst_34 = arith.constant 1.000000e+00 : f32
    %85 = vector.broadcast %cst_34 : f32 to vector<32x1xf32>
    %86 = arith.addf %85, %84 : vector<32x1xf32>
    %87 = tpu.reciprocal %86 {approx = true} : vector<32x1xf32> -> vector<32x1xf32>
    %88 = vector.broadcast %77 : f32 to vector<32x1xf32>
    %89 = arith.mulf %87, %88 : vector<32x1xf32>
    %cst_35 = arith.constant 1.100000e+00 : f32
    %90 = vector.broadcast %cst_35 : f32 to vector<32x1xf32>
    %91 = arith.addf %89, %90 : vector<32x1xf32>
    %92 = arith.mulf %80, %80 : vector<32x128xf32>
    %cst_36 = arith.constant dense<0.000000e+00> : vector<32xf32>
    %93 = vector.multi_reduction <add>, %92, %cst_36 [1] : vector<32x128xf32> to vector<32xf32>
    %94 = vector.shape_cast %93 : vector<32xf32> to vector<32x1xf32>
    %95 = arith.mulf %81, %81 : vector<32x1xf32>
    %96 = arith.subf %94, %95 : vector<32x1xf32>
    %cst_37 = arith.constant 9.99999993E-9 : f32
    %97 = vector.broadcast %cst_37 : f32 to vector<32x1xf32>
    %98 = arith.maximumf %96, %97 : vector<32x1xf32>
    %99 = arith.mulf %91, %91 : vector<32x1xf32>
    %cst_38 = arith.constant 1.000000e+00 : f32
    %100 = vector.broadcast %cst_38 : f32 to vector<32x1xf32>
    %101 = arith.subf %99, %100 : vector<32x1xf32>
    %102 = tpu.reciprocal %98 {approx = true} : vector<32x1xf32> -> vector<32x1xf32>
    %103 = arith.mulf %101, %102 : vector<32x1xf32>
    %104 = math.sqrt %103 : vector<32x1xf32>
    %105 = vector.broadcast %104 : vector<32x1xf32> to vector<32x128xf32>
    %106 = arith.mulf %80, %105 : vector<32x128xf32>
    %107 = vector.shape_cast %2 : vector<1x128xi1> to vector<1x128xi1>
    %108 = vector.broadcast %107 : vector<1x128xi1> to vector<32x128xi1>
    %109 = vector.shape_cast %91 : vector<32x1xf32> to vector<32x1xf32>
    %110 = vector.broadcast %109 : vector<32x1xf32> to vector<32x128xf32>
    %111 = arith.select %108, %110, %106 : vector<32x128xi1>, vector<32x128xf32>
    %cst_39 = arith.constant dense<0.000000e+00> : vector<32x128xf32>
    %112 = tpu.matmul %71, %111, %cst_39 {dimension_numbers = #tpu.dot_dimension_numbers<[1], [0], [0], [1], [0, 0, 1, 1], [], []>} : vector<32x32xf32>, vector<32x128xf32>, vector<32x128xf32> -> vector<32x128xf32>
    %113 = vector.extract_strided_slice %112 {offsets = [0, 0], sizes = [32, 1], strides = [1, 1]} : vector<32x128xf32> to vector<32x1xf32>
    %114 = arith.mulf %112, %112 : vector<32x128xf32>
    %cst_40 = arith.constant dense<0.000000e+00> : vector<32xf32>
    %115 = vector.multi_reduction <add>, %114, %cst_40 [1] : vector<32x128xf32> to vector<32xf32>
    %116 = vector.shape_cast %115 : vector<32xf32> to vector<32x1xf32>
    %cst_41 = arith.constant 2.000000e+00 : f32
    %117 = vector.broadcast %cst_41 : f32 to vector<32x1xf32>
    %118 = arith.mulf %117, %113 : vector<32x1xf32>
    %119 = arith.mulf %118, %113 : vector<32x1xf32>
    %120 = arith.subf %116, %119 : vector<32x1xf32>
    %121 = math.absf %120 : vector<32x1xf32>
    %cst_42 = arith.constant 9.99999993E-9 : f32
    %122 = vector.broadcast %cst_42 : f32 to vector<32x1xf32>
    %123 = arith.maximumf %121, %122 : vector<32x1xf32>
    %124 = math.sqrt %123 : vector<32x1xf32>
    %125 = tpu.reciprocal %124 {approx = true} : vector<32x1xf32> -> vector<32x1xf32>
    %126 = vector.broadcast %125 : vector<32x1xf32> to vector<32x128xf32>
    %127 = arith.mulf %112, %126 : vector<32x128xf32>
    %c1_43 = arith.constant 1 : index
    %c0_44 = arith.constant 0 : index
    %c0_45 = arith.constant 0 : index
    %128 = vector.load %arg7[%c1_43, %c0_44, %c0_45] : memref<2x128x128xf32, #tpu.memory_space<vmem>>, vector<1x128x128xf32>
    %129 = vector.shape_cast %128 : vector<1x128x128xf32> to vector<128x128xf32>
    %c1_46 = arith.constant 1 : index
    %c0_47 = arith.constant 0 : index
    %c0_48 = arith.constant 0 : index
    %130 = vector.load %arg8[%c1_46, %c0_47, %c0_48] : memref<2x1x128xf32, #tpu.memory_space<vmem>>, vector<1x1x128xf32>
    %131 = vector.shape_cast %130 : vector<1x1x128xf32> to vector<1x128xf32>
    %c2 = arith.constant 2 : index
    %132 = memref.load %arg0[%c2] : memref<3xf32, #tpu.memory_space<smem>>
    %cst_49 = arith.constant 0.000000e+00 : f32
    %133 = vector.broadcast %cst_49 : f32 to vector<32x128xf32>
    %134 = arith.maximumf %127, %133 : vector<32x128xf32>
    %cst_50 = arith.constant dense<0.000000e+00> : vector<32x128xf32>
    %135 = tpu.matmul %134, %129, %cst_50 {dimension_numbers = #tpu.dot_dimension_numbers<[1], [0], [0], [1], [0, 0, 1, 1], [], []>} : vector<32x128xf32>, vector<128x128xf32>, vector<32x128xf32> -> vector<32x128xf32>
    %136 = vector.broadcast %131 : vector<1x128xf32> to vector<32x128xf32>
    %137 = arith.addf %135, %136 : vector<32x128xf32>
    %138 = vector.extract_strided_slice %137 {offsets = [0, 0], sizes = [32, 1], strides = [1, 1]} : vector<32x128xf32> to vector<32x1xf32>
    %cst_51 = arith.constant 0.000000e+00 : f32
    %139 = vector.broadcast %cst_51 : f32 to vector<32x1xf32>
    %140 = arith.subf %139, %138 : vector<32x1xf32>
    %141 = math.exp %140 : vector<32x1xf32>
    %cst_52 = arith.constant 1.000000e+00 : f32
    %142 = vector.broadcast %cst_52 : f32 to vector<32x1xf32>
    %143 = arith.addf %142, %141 : vector<32x1xf32>
    %144 = tpu.reciprocal %143 {approx = true} : vector<32x1xf32> -> vector<32x1xf32>
    %145 = vector.broadcast %132 : f32 to vector<32x1xf32>
    %146 = arith.mulf %144, %145 : vector<32x1xf32>
    %cst_53 = arith.constant 1.100000e+00 : f32
    %147 = vector.broadcast %cst_53 : f32 to vector<32x1xf32>
    %148 = arith.addf %146, %147 : vector<32x1xf32>
    %149 = arith.mulf %137, %137 : vector<32x128xf32>
    %cst_54 = arith.constant dense<0.000000e+00> : vector<32xf32>
    %150 = vector.multi_reduction <add>, %149, %cst_54 [1] : vector<32x128xf32> to vector<32xf32>
    %151 = vector.shape_cast %150 : vector<32xf32> to vector<32x1xf32>
    %152 = arith.mulf %138, %138 : vector<32x1xf32>
    %153 = arith.subf %151, %152 : vector<32x1xf32>
    %cst_55 = arith.constant 9.99999993E-9 : f32
    %154 = vector.broadcast %cst_55 : f32 to vector<32x1xf32>
    %155 = arith.maximumf %153, %154 : vector<32x1xf32>
    %156 = arith.mulf %148, %148 : vector<32x1xf32>
    %cst_56 = arith.constant 1.000000e+00 : f32
    %157 = vector.broadcast %cst_56 : f32 to vector<32x1xf32>
    %158 = arith.subf %156, %157 : vector<32x1xf32>
    %159 = tpu.reciprocal %155 {approx = true} : vector<32x1xf32> -> vector<32x1xf32>
    %160 = arith.mulf %158, %159 : vector<32x1xf32>
    %161 = math.sqrt %160 : vector<32x1xf32>
    %162 = vector.broadcast %161 : vector<32x1xf32> to vector<32x128xf32>
    %163 = arith.mulf %137, %162 : vector<32x128xf32>
    %164 = vector.shape_cast %2 : vector<1x128xi1> to vector<1x128xi1>
    %165 = vector.broadcast %164 : vector<1x128xi1> to vector<32x128xi1>
    %166 = vector.shape_cast %148 : vector<32x1xf32> to vector<32x1xf32>
    %167 = vector.broadcast %166 : vector<32x1xf32> to vector<32x128xf32>
    %168 = arith.select %165, %167, %163 : vector<32x128xi1>, vector<32x128xf32>
    %cst_57 = arith.constant dense<0.000000e+00> : vector<32x128xf32>
    %169 = tpu.matmul %71, %168, %cst_57 {dimension_numbers = #tpu.dot_dimension_numbers<[1], [0], [0], [1], [0, 0, 1, 1], [], []>} : vector<32x32xf32>, vector<32x128xf32>, vector<32x128xf32> -> vector<32x128xf32>
    %170 = vector.extract_strided_slice %169 {offsets = [0, 0], sizes = [32, 1], strides = [1, 1]} : vector<32x128xf32> to vector<32x1xf32>
    %171 = arith.mulf %169, %169 : vector<32x128xf32>
    %cst_58 = arith.constant dense<0.000000e+00> : vector<32xf32>
    %172 = vector.multi_reduction <add>, %171, %cst_58 [1] : vector<32x128xf32> to vector<32xf32>
    %173 = vector.shape_cast %172 : vector<32xf32> to vector<32x1xf32>
    %cst_59 = arith.constant 2.000000e+00 : f32
    %174 = vector.broadcast %cst_59 : f32 to vector<32x1xf32>
    %175 = arith.mulf %174, %170 : vector<32x1xf32>
    %176 = arith.mulf %175, %170 : vector<32x1xf32>
    %177 = arith.subf %173, %176 : vector<32x1xf32>
    %178 = math.absf %177 : vector<32x1xf32>
    %cst_60 = arith.constant 9.99999993E-9 : f32
    %179 = vector.broadcast %cst_60 : f32 to vector<32x1xf32>
    %180 = arith.maximumf %178, %179 : vector<32x1xf32>
    %181 = math.sqrt %180 : vector<32x1xf32>
    %182 = tpu.reciprocal %181 {approx = true} : vector<32x1xf32> -> vector<32x1xf32>
    %183 = vector.broadcast %182 : vector<32x1xf32> to vector<32x128xf32>
    %184 = arith.mulf %169, %183 : vector<32x128xf32>
    %c0_61 = arith.constant 0 : index
    %c0_62 = arith.constant 0 : index
    %185 = vector.load %arg4[%c0_61, %c0_62] : memref<2x32xf32, #tpu.memory_space<vmem>>, vector<2x32xf32>
    %cst_63 = arith.constant dense<0.000000e+00> : vector<2x128xf32>
    %186 = tpu.matmul %185, %184, %cst_63 {dimension_numbers = #tpu.dot_dimension_numbers<[1], [0], [0], [1], [0, 0, 1, 1], [], []>} : vector<2x32xf32>, vector<32x128xf32>, vector<2x128xf32> -> vector<2x128xf32>
    %187 = vector.extract_strided_slice %186 {offsets = [0, 0], sizes = [2, 1], strides = [1, 1]} : vector<2x128xf32> to vector<2x1xf32>
    %188 = arith.mulf %186, %186 : vector<2x128xf32>
    %cst_64 = arith.constant dense<0.000000e+00> : vector<2xf32>
    %189 = vector.multi_reduction <add>, %188, %cst_64 [1] : vector<2x128xf32> to vector<2xf32>
    %190 = vector.shape_cast %189 : vector<2xf32> to vector<2x1xf32>
    %cst_65 = arith.constant 2.000000e+00 : f32
    %191 = vector.broadcast %cst_65 : f32 to vector<2x1xf32>
    %192 = arith.mulf %191, %187 : vector<2x1xf32>
    %193 = arith.mulf %192, %187 : vector<2x1xf32>
    %194 = arith.subf %190, %193 : vector<2x1xf32>
    %195 = math.absf %194 : vector<2x1xf32>
    %cst_66 = arith.constant 9.99999993E-9 : f32
    %196 = vector.broadcast %cst_66 : f32 to vector<2x1xf32>
    %197 = arith.maximumf %195, %196 : vector<2x1xf32>
    %198 = math.sqrt %197 : vector<2x1xf32>
    %199 = tpu.reciprocal %198 {approx = true} : vector<2x1xf32> -> vector<2x1xf32>
    %200 = vector.broadcast %199 : vector<2x1xf32> to vector<2x128xf32>
    %201 = arith.mulf %186, %200 : vector<2x128xf32>
    %c0_67 = arith.constant 0 : index
    %c0_68 = arith.constant 0 : index
    %202 = vector.load %arg9[%c0_67, %c0_68] : memref<2x128xf32, #tpu.memory_space<vmem>>, vector<2x128xf32>
    tpu.vector_store %arg9[%c0_67, %c0_68], %201 {strides = array<i32>} : memref<2x128xf32, #tpu.memory_space<vmem>>, vector<2x128xf32>,
    return
  }
}

</mosaic_0001>

<bundles_post_ra>
// kernel: hyperbolic_jtmpn_forward.1
= control target key start
LH: loop header
LB: loop body
LE: loop exit
PB: predicated region body
PF: predicated region fallthrough
CT: control target
= control target key end

     0   :  { %14 = vsyncpa [#allocation5], 0  ;;  %s2447_s0 = inlined_call_operand.vmem [shape: f32[3], index: 0, kind: input, shape index: {}]   ;;  %s2448_s1 = inlined_call_operand.vmem [shape: f32[24,128], index: 1, kind: input, shape index: {}]   ;;  %s2449_s2 = inlined_call_operand.vmem [shape: f32[8,128], index: 2, kind: input, shape index: {}]   ;;  %s2450_s3 = inlined_call_operand.vmem [shape: f32[32,32], index: 3, kind: input, shape index: {}]   ;;  %s2451_s4 = inlined_call_operand.vmem [shape: f32[2,32], index: 4, kind: input, shape index: {}]   ;;  %s2452_s5 = inlined_call_operand.vmem [shape: f32[128,128], index: 5, kind: input, shape index: {}]   ;;  %s2453_s6 = inlined_call_operand.vmem [shape: f32[1,128], index: 6, kind: input, shape index: {}]   ;;  %s2454_s7 = inlined_call_operand.vmem [shape: f32[2,128,128], index: 7, kind: input, shape index: {}]   ;;  %s2455_s8 = inlined_call_operand.vmem [shape: f32[2,1,128], index: 8, kind: input, shape index: {}]   ;;  %s2456_s9 = inlined_call_operand.hbm [shape: f32[2,128], index: 9, kind: output, shape index: {}]  }
   0x1   :  { %15 = vsyncpa [#allocation4], 0  ;;  %s22_s11 = sshll.u32 %s2447_s0, 4  ;;  %s23_s11 = int_to_ptr.vmem [resolvable:$true] %s22_s11 }
   0x2   :  { %s1924_s12 = scalar_lea.vmem %s23_s11, 16  ;;  %p1929_p1 = scmp.lt.s32.totalorder %s23_s11, %s23_s11 }
   0x3   :  { %p1925_p0 = scmp.ne.s32.totalorder %s23_s11, %s1924_s12  ;;  %p1930_p2 = scmp.lt.s32.totalorder %s1924_s12, %s1924_s12 }
   0x5   :  { %p1931_p3 = por %p1930_p2, %p1929_p1 }
   0x7   :  { %p1932_p4 = pnand %p1931_p3, %p1925_p0 }
   0x9   :  { %1935 = shalt.err (!%p1932_p4)
}
   0xa   :  { %s1962_s13 = smov [#allocation3]  }
   0xb   :  { %25 = dma.vmem_to_smem %s23_s11, 16, %s1962_s13, [#allocation5]  }
   0xc   :  { %1958 = dma.done.wait [#allocation5], 16  }
   0xd   :  { %1959 = vsyncadd [#allocation5], 4294967280 }
   0xe   :  { %45 = sfence }
   0xf   :  { %v2024_v0 = vld [vmem:[%s2448_s1 + $0x10] sm:$0xff]  ;;  %v2029_v1 = vld [vmem:[%s2448_s1] sm:$0xff]  ;;  %v2034_v2 = vld [vmem:[%s2448_s1 + $0x8] sm:$0xff]  ;;  %v1963_v9 = vmov 0.0|0.0   ;;  %vm1964_vm6 = vmmov 0   ;;  %s1353_s0 = sld [smem:[#allocation3 + $0x1]] }
  0x10   :  { %v54_v3 = vmul.f32 %v2024_v0, %v2024_v0  ;;  %v52_v4 = vmul.f32 %v2029_v1, %v2029_v1  ;;  %v53_v5 = vmul.f32 %v2034_v2, %v2034_v2  ;;  %v147_v6 = vld [vmem:[%s2452_s5] sm:$0xff]  ;;  %v148_v7 = vld [vmem:[%s2452_s5 + $0x8] sm:$0xff]  ;;  %v149_v8 = vld [vmem:[%s2452_s5 + $0x10] sm:$0xff]  ;;  %1627 = vmatprep.subr.bf16.mxu0 %v1963_v9 }
  0x11   :  { %v1628_v10 = vpack.c.bf16 %v148_v7, %v147_v6  ;;  %v150_v11 = vld [vmem:[%s2452_s5 + $0x18] sm:$0xff]  ;;  %v151_v13 = vld [vmem:[%s2452_s5 + $0x20] sm:$0xff]  ;;  %v152_v14 = vld [vmem:[%s2452_s5 + $0x28] sm:$0xff] }
  0x12   :  { %59 = vadd.xlane.f32.xlu1 %v54_v3  ;;  %55 = vadd.xlane.f32.xlu0 %v52_v4  ;;  %v1631_v12 = vpack.c.bf16 %v150_v11, %v149_v8  ;;  %v1634_v15 = vpack.c.bf16 %v152_v14, %v151_v13  ;;  %v153_v16 = vld [vmem:[%s2452_s5 + $0x30] sm:$0xff]  ;;  %v154_v17 = vld [vmem:[%s2452_s5 + $0x38] sm:$0xff]  ;;  %v160_v11 = vld [vmem:[%s2452_s5 + $0x68] sm:$0xff]  ;;  %v1965_v13 = vmov 0.0  }
  0x13   :  { %1629 = vmatpush3.bf16.msra.mxu0 %v1628_v10  ;;  %v1637_v18 = vpack.c.bf16 %v154_v17, %v153_v16  ;;  %v157_v6 = vld [vmem:[%s2452_s5 + $0x50] sm:$0xff]  ;;  %v158_v7 = vld [vmem:[%s2452_s5 + $0x58] sm:$0xff]  ;;  %v159_v10 = vld [vmem:[%s2452_s5 + $0x60] sm:$0xff]  ;;  %1503 = vmatprep.mubr.msk.f32.mxu0 %vm1964_vm6, %v1965_v13 }
  0x14   :  { %1630 = vmatprep.subr.bf16.mxu0 %v1963_v9  ;;  %v1643_v8 = vpack.c.bf16 %v158_v7, %v157_v6  ;;  %v161_v14 = vld [vmem:[%s2452_s5 + $0x70] sm:$0xff]  ;;  %v374_v7 = vld [vmem:[%s2454_s7 + $0x20] sm:$0xff] }
  0x16   :  { %57 = vadd.xlane.f32.xlu0 %v53_v5 }
  0x17   :  { %1632 = vmatpush3.bf16.msra.mxu0 %v1631_v12  ;;  %v1646_v12 = vpack.c.bf16 %v160_v11, %v159_v10  ;;  %v376_v11 = vld [vmem:[%s2454_s7 + $0x30] sm:$0xff] }
  0x18   :  { %1633 = vmatprep.subr.bf16.mxu0 %v1963_v9 }
  0x1b   :  { %1635 = vmatpush3.bf16.msra.mxu0 %v1634_v15  ;;  %v162_v15 = vld [vmem:[%s2452_s5 + $0x78] sm:$0xff] }
  0x1c   :  { %1636 = vmatprep.subr.bf16.mxu0 %v1963_v9  ;;  %v1649_v16 = vpack.c.bf16 %v162_v15, %v161_v14  ;;  %v378_v15 = vld [vmem:[%s2454_s7 + $0x40] sm:$0xff] }
  0x1f   :  { %1638 = vmatpush3.bf16.msra.mxu0 %v1637_v18 }
  0x20   :  { %1639 = vmatprep.subr.bf16.mxu0 %v1963_v9 }
  0x9f   :  { %v60_v19 = vpop.xlane.xlu1 %59  ;;  %v56_v20 = vpop.xlane.xlu0 %55 }
  0xa0   :  { %v63_v21 = vmax.f32 %v60_v19, 1e-08  ;;  %v61_v22 = vmax.f32 %v56_v20, 1e-08 }
  0xa2   :  { %1770 = vrsqrt.f32 %v63_v21  ;;  %vm80_vm0 = vcmp.eq.f32.partialorder %v63_v21, inf  ;;  %v83_v28 = vand.u32 2147483648, %v63_v21  ;;  %vm66_vm1 = vcmp.eq.f32.partialorder %v61_v22, inf }
  0xa3   :  { %1772 = vrsqrt.f32 %v61_v22  ;;  %v58_v23 = vpop.xlane.xlu0 %57  ;;  %v69_v30 = vand.u32 2147483648, %v61_v22  ;;  %vm82_vm2 = vcmp.eq.f32.partialorder %v63_v21, 0.0  ;;  %vm68_vm3 = vcmp.eq.f32.partialorder %v61_v22, 0.0 }
  0xa4   :  { %v62_v24 = vmax.f32 %v58_v23, 1e-08  ;;  %v46_v23 = vlaneseq }
  0xa6   :  { %1774 = vrsqrt.f32 %v62_v24  ;;  %vm73_vm4 = vcmp.eq.f32.partialorder %v62_v24, inf  ;;  %v76_v38 = vand.u32 2147483648, %v62_v24  ;;  %vm75_vm5 = vcmp.eq.f32.partialorder %v62_v24, 0.0 }
  0xac   :  { %v1771_v25 = vpop.eup %1770 }
  0xad   :  { %v1773_v26 = vpop.eup %1772  ;;  %v79_v27 = vmul.f32 %v1771_v25, %v63_v21 }
  0xae   :  { %v65_v29 = vmul.f32 %v1773_v26, %v61_v22 }
  0xaf   :  { %v81_v31 = vsel %vm80_vm0, %v63_v21, %v79_v27 }
  0xb0   :  { %v1775_v32 = vpop.eup %1774  ;;  %v67_v33 = vsel %vm66_vm1, %v61_v22, %v65_v29  ;;  %v84_v34 = vsel %vm82_vm2, %v83_v28, %v81_v31 }
  0xb1   :  { %v72_v35 = vmul.f32 %v1775_v32, %v62_v24  ;;  %v70_v36 = vsel %vm68_vm3, %v69_v30, %v67_v33  ;;  %v89_v37 = vmul.f32 1.442695, %v84_v34 }
  0xb2   :  { %v85_v39 = vmul.f32 1.442695, %v70_v36 }
  0xb3   :  { %1776 = vpow2.f32 %v89_v37  ;;  %v74_v40 = vsel %vm73_vm4, %v62_v24, %v72_v35  ;;  %v2107_v24 = vand.u32 127, %v46_v23 }
  0xb4   :  { %1778 = vpow2.f32 %v85_v39  ;;  %v77_v41 = vsel %vm75_vm5, %v76_v38, %v74_v40 }
  0xb5   :  { %v87_v42 = vmul.f32 1.442695, %v77_v41  ;;  %vm48_vm7 = vcmp.eq.s32.totalorder %v2107_v24, 0 }
  0xb7   :  { %1780 = vpow2.f32 %v87_v42 }
  0xbd   :  { %v1777_v43 = vpop.eup %1776 }
  0xbe   :  { %v1779_v44 = vpop.eup %1778  ;;  %1782 = vrcp.f32 %v1777_v43 }
  0xbf   :  { %1784 = vrcp.f32 %v1779_v44 }
  0xc1   :  { %v1781_v45 = vpop.eup %1780 }
  0xc2   :  { %1786 = vrcp.f32 %v1781_v45 }
  0xc3   :  { %1788 = vrcp.f32 %v70_v36 }
  0xc4   :  { %1790 = vrcp.f32 %v84_v34 }
  0xc5   :  { %1792 = vrcp.f32 %v77_v41 }
  0xc8   :  { %v1783_v46 = vpop.eup %1782 }
  0xc9   :  { %v1785_v47 = vpop.eup %1784  ;;  %v96_v48 = vsub.f32 %v1777_v43, %v1783_v46  ;;  %v1966_v43 = vmov 0  }
  0xca   :  { %v94_v49 = vsub.f32 %v1779_v44, %v1785_v47  ;;  %1743 = vset.pattern.permute.xlu0 %v1966_v43  ;;  %1744 = vset.pattern.permute.xlu1 %v1966_v43  ;;  %v1349_v44 = vld [vmem:[%s2453_s6] ss:$0 sm:$0xff]  ;;  %s164_s6 = sld [smem:[#allocation3]] }
  0xcb   :  { %v99_v50 = vmul.f32 0.5, %v96_v48 }
  0xcc   :  { %v1787_v51 = vpop.eup %1786  ;;  %v97_v52 = vmul.f32 0.5, %v94_v49 }
  0xcd   :  { %v95_v53 = vsub.f32 %v1781_v45, %v1787_v51  ;;  %v102_v55 = vmul.f32 %v99_v50, %v2024_v0  ;;  %v1789_v56 = vpop.eup %1788  ;;  %v155_v0 = vld [vmem:[%s2452_s5 + $0x40] sm:$0xff] }
  0xce   :  { %v100_v54 = vmul.f32 %v97_v52, %v2029_v1  ;;  %v1791_v59 = vpop.eup %1790  ;;  %v156_v1 = vld [vmem:[%s2452_s5 + $0x48] sm:$0xff] }
  0xcf   :  { %v98_v57 = vmul.f32 0.5, %v95_v53  ;;  %v1793_v61 = vpop.eup %1792  ;;  %v2074_v63 = vmul.f32 %v1791_v59, %v102_v55 }
  0xd0   :  { %v106_v58 = vmul.f32 %v1789_v56, %v100_v54 }
  0xd1   :  { %v101_v60 = vmul.f32 %v98_v57, %v2034_v2  ;;  %v111_v5 = vmul.f32 %v2074_v63, %v2074_v63  ;;  %v1640_v2 = vpack.c.bf16 %v156_v1, %v155_v0  ;;  %v372_v0 = vld [vmem:[%s2454_s7 + $0x10] sm:$0xff] }
  0xd2   :  { %v109_v62 = vmul.f32 %v106_v58, %v106_v58 }
  0xd3   :  { %v107_v3 = vmul.f32 %v1793_v61, %v101_v60  ;;  %1641 = vmatpush3.bf16.msra.mxu0 %v1640_v2  ;;  %v2146_v61 = vstv %s164_s6  ;;  %v373_v2 = vld [vmem:[%s2454_s7 + $0x18] sm:$0xff] }
  0xd4   :  { %112 = vadd.xlane.f32.xlu1 %v109_v62  ;;  %1642 = vmatprep.subr.bf16.mxu0 %v1963_v9  ;;  %v1655_v6 = vpack.c.bf16 %v373_v2, %v372_v0 }
  0xd5   :  { %v110_v4 = vmul.f32 %v107_v3, %v107_v3 }
  0xd7   :  { %114 = vadd.xlane.f32.xlu0 %v110_v4  ;;  %1644 = vmatpush3.bf16.msra.mxu0 %v1643_v8  ;;  %v370_v4 = vld [vmem:[%s2454_s7] sm:$0xff]  ;;  %v375_v8 = vld [vmem:[%s2454_s7 + $0x28] sm:$0xff] }
  0xd8   :  { %116 = vadd.xlane.f32.xlu1 %v111_v5  ;;  %1645 = vmatprep.subr.bf16.mxu0 %v1963_v9  ;;  %v371_v5 = vld [vmem:[%s2454_s7 + $0x8] sm:$0xff]  ;;  %v1659_v10 = vpack.c.bf16 %v375_v8, %v374_v7 }
  0xd9   :  { %v1651_v1 = vpack.c.bf16 %v371_v5, %v370_v4 }
  0xdb   :  { %1647 = vmatpush3.bf16.msra.mxu0 %v1646_v12  ;;  %1652 = vmatprep.subr.bf16.mxu1 %v1651_v1  ;;  %v377_v12 = vld [vmem:[%s2454_s7 + $0x38] sm:$0xff] }
  0xdc   :  { %1648 = vmatprep.subr.bf16.mxu0 %v1963_v9  ;;  %1654 = vmatpush3.bf16.msra.mxu1 %v1651_v1  ;;  %v1663_v14 = vpack.c.bf16 %v377_v12, %v376_v11 }
  0xdd   :  { %1656 = vmatprep.subr.bf16.mxu1 %v1655_v6 }
  0xdf   :  { %1650 = vmatpush3.bf16.msra.mxu0 %v1649_v16  ;;  %v379_v16 = vld [vmem:[%s2454_s7 + $0x48] sm:$0xff] }
  0xe0   :  { %1658 = vmatpush3.bf16.msra.mxu1 %v1655_v6 }
  0xe1   :  { %1660 = vmatprep.subr.bf16.mxu1 %v1659_v10 }
  0xe4   :  { %1662 = vmatpush3.bf16.msra.mxu1 %v1659_v10  ;;  %v357_v10 = vld [vmem:[%s2449_s2] sm:$0xff] }
  0xe5   :  { %1664 = vmatprep.subr.bf16.mxu1 %v1663_v14  ;;  %1544 = vmatprep.mubr.f32.mxu1 %v357_v10 }
  0xe8   :  { %1666 = vmatpush3.bf16.msra.mxu1 %v1663_v14 }
 0x161   :  { %v113_v17 = vpop.xlane.xlu1 %112 }
 0x162   :  { %v118_v18 = vadd.f32 1.0, %v113_v17  ;;  %v1667_v17 = vpack.c.bf16 %v379_v16, %v378_v15 }
 0x164   :  { %1794 = vrsqrt.f32 %v118_v18  ;;  %v115_v19 = vpop.xlane.xlu0 %114  ;;  %vm123_vm8 = vcmp.eq.f32.partialorder %v118_v18, inf  ;;  %v126_v27 = vand.u32 2147483648, %v118_v18  ;;  %vm125_vm9 = vcmp.eq.f32.partialorder %v118_v18, 0.0  ;;  %1668 = vmatprep.subr.bf16.mxu1 %v1667_v17 }
 0x165   :  { %v117_v20 = vpop.xlane.xlu1 %116  ;;  %v119_v21 = vadd.f32 1.0, %v115_v19  ;;  %v381_v19 = vld [vmem:[%s2454_s7 + $0x58] sm:$0xff]  ;;  %1670 = vmatpush3.bf16.msra.mxu1 %v1667_v17 }
 0x166   :  { %v120_v22 = vadd.f32 1.0, %v117_v20 }
 0x167   :  { %1796 = vrsqrt.f32 %v119_v21  ;;  %vm130_vm10 = vcmp.eq.f32.partialorder %v119_v21, inf  ;;  %v133_v34 = vand.u32 2147483648, %v119_v21  ;;  %vm132_vm11 = vcmp.eq.f32.partialorder %v119_v21, 0.0 }
 0x168   :  { %1798 = vrsqrt.f32 %v120_v22  ;;  %vm137_vm12 = vcmp.eq.f32.partialorder %v120_v22, inf  ;;  %v140_v40 = vand.u32 2147483648, %v120_v22  ;;  %vm139_vm13 = vcmp.eq.f32.partialorder %v120_v22, 0.0 }
 0x16e   :  { %v1795_v25 = vpop.eup %1794 }
 0x16f   :  { %v122_v26 = vmul.f32 %v1795_v25, %v118_v18  ;;  %v384_v25 = vld [vmem:[%s2454_s7 + $0x70] sm:$0xff] }
 0x171   :  { %v1797_v28 = vpop.eup %1796  ;;  %v124_v29 = vsel %vm123_vm8, %v118_v18, %v122_v26  ;;  %v380_v18 = vld [vmem:[%s2454_s7 + $0x50] sm:$0xff]  ;;  %v385_v26 = vld [vmem:[%s2454_s7 + $0x78] sm:$0xff] }
 0x172   :  { %v1799_v30 = vpop.eup %1798  ;;  %v127_v31 = vsel %vm125_vm9, %v126_v27, %v124_v29  ;;  %v129_v32 = vmul.f32 %v1797_v28, %v119_v21  ;;  %v1671_v20 = vpack.c.bf16 %v381_v19, %v380_v18  ;;  %v1679_v27 = vpack.c.bf16 %v385_v26, %v384_v25 }
 0x173   :  { %v144_v33 = vsel %vm48_vm7, %v127_v31, %v106_v58  ;;  %v136_v35 = vmul.f32 %v1799_v30, %v120_v22 }
 0x174   :  { %1504 = vmatmul.mubr.f32.vlgmr.msra.gmra.mrb[0].mxu0 %v144_v33  ;;  %v131_v36 = vsel %vm130_vm10, %v119_v21, %v129_v32  ;;  %v382_v21 = vld [vmem:[%s2454_s7 + $0x60] sm:$0xff]  ;;  %1672 = vmatprep.subr.bf16.mxu1 %v1671_v20 }
 0x175   :  { %1506 = vmatprep.mubr.msk.f32.mxu0 %vm1964_vm6, %v1965_v13  ;;  %v134_v37 = vsel %vm132_vm11, %v133_v34, %v131_v36  ;;  %v138_v38 = vsel %vm137_vm12, %v120_v22, %v136_v35  ;;  %v383_v22 = vld [vmem:[%s2454_s7 + $0x68] sm:$0xff]  ;;  %1674 = vmatpush3.bf16.msra.mxu1 %v1671_v20 }
 0x176   :  { %v145_v39 = vsel %vm48_vm7, %v134_v37, %v107_v3  ;;  %v141_v41 = vsel %vm139_vm13, %v140_v40, %v138_v38  ;;  %v1675_v23 = vpack.c.bf16 %v383_v22, %v382_v21 }
 0x177   :  { %v146_v42 = vsel %vm48_vm7, %v141_v41, %v2074_v63 }
 0x178   :  { %1507 = vmatmul.mubr.f32.gmra.mrb[2].mxu0 %v145_v39  ;;  %1676 = vmatprep.subr.bf16.mxu1 %v1675_v23 }
 0x179   :  { %1509 = vmatprep.mubr.msk.f32.mxu0 %vm1964_vm6, %v1965_v13  ;;  %1678 = vmatpush3.bf16.msra.mxu1 %v1675_v23 }
 0x17a   :  { %1680 = vmatprep.subr.bf16.mxu1 %v1679_v27 }
 0x17c   :  { %1510 = vmatmul.mubr.f32.gmra.mrb[4].mxu0 %v146_v42 }
 0x17d   :  { %1682 = vmatpush3.bf16.msra.mxu1 %v1679_v27 }
 0x247   :  { %v237_v45 = vpop.f32.mrb[0].mxu0 }
 0x248   :  { %v2124_v46 = vadd.f32 %v1349_v44, %v237_v45  ;;  %v1505_v47 = vpop.f32.mrb[1].mxu0 }
 0x24a   :  { %v251_v48 = vsub.f32 0.0, %v2124_v46  ;;  %v2129_v49 = vmul.f32 %v2124_v46, %v2124_v46 }
 0x24b   :  { %v242_v50 = vpop.f32.mrb[2].mxu0 }
 0x24c   :  { %v254_v51 = vmul.f32 1.442695, %v251_v48  ;;  %v2131_v52 = vadd.f32 %v1349_v44, %v242_v50  ;;  %276 = vadd.xlane.f32.xlu0 %v2129_v49  ;;  %v1508_v53 = vpop.f32.mrb[3].mxu0 }
 0x24e   :  { %1800 = vpow2.f32 %v254_v51  ;;  %v2136_v54 = vmul.f32 %v2131_v52, %v2131_v52  ;;  %v252_v28 = vsub.f32 0.0, %v2131_v52 }
 0x24f   :  { %v247_v55 = vpop.f32.mrb[4].mxu0 }
 0x250   :  { %v2138_v56 = vadd.f32 %v1349_v44, %v247_v55  ;;  %278 = vadd.xlane.f32.xlu1 %v2136_v54  ;;  %v1511_v57 = vpop.f32.mrb[5].mxu0  ;;  %v256_v29 = vmul.f32 1.442695, %v252_v28 }
 0x252   :  { %v2143_v58 = vmul.f32 %v2138_v56, %v2138_v56  ;;  %v253_v30 = vsub.f32 0.0, %v2138_v56 }
 0x254   :  { %280 = vadd.xlane.f32.xlu0 %v2143_v58  ;;  %v258_v31 = vmul.f32 1.442695, %v253_v30 }
 0x258   :  { %v1801_v59 = vpop.eup %1800 }
 0x259   :  { %v260_v60 = vadd.f32 1.0, %v1801_v59 }
 0x25b   :  { %1802 = vrcp.f32 %v260_v60 }
 0x25c   :  { %1804 = vpow2.f32 %v256_v29 }
 0x25d   :  { %1806 = vpow2.f32 %v258_v31 }
 0x265   :  { %v1803_v62 = vpop.eup %1802 }
 0x266   :  { %v267_v63 = vmul.f32 %v1803_v62, %v2146_v61  ;;  %v1805_v32 = vpop.eup %1804 }
 0x267   :  { %v261_v33 = vadd.f32 1.0, %v1805_v32  ;;  %v1807_v34 = vpop.eup %1806 }
 0x268   :  { %v2149_v3 = vadd.f32 1.1, %v267_v63  ;;  %v262_v35 = vadd.f32 1.0, %v1807_v34  ;;  %v1354_v34 = vld [vmem:[%s2455_s8] ss:$0 sm:$0xff] }
 0x269   :  { %1808 = vrcp.f32 %v261_v33 }
 0x26a   :  { %341 = vperm.xlu0 %1743, %v2149_v3   ;;  %1810 = vrcp.f32 %v262_v35  ;;  %v288_v50 = vmul.f32 %v2149_v3, %v2149_v3 }
 0x26c   :  { %v1350_v55 = vadd.f32 -1.0, %v288_v50 }
 0x273   :  { %v1809_v38 = vpop.eup %1808 }
 0x274   :  { %v268_v42 = vmul.f32 %v1809_v38, %v2146_v61  ;;  %v1811_v43 = vpop.eup %1810 }
 0x276   :  { %v271_v48 = vadd.f32 1.1, %v268_v42 }
 0x278   :  { %v289_v53 = vmul.f32 %v271_v48, %v271_v48 }
 0x27a   :  { %v1351_v60 = vadd.f32 -1.0, %v289_v53 }
 0x2d9   :  { %v277_v36 = vpop.xlane.xlu0 %276 }
 0x2da   :  { %v282_v37 = vsub.f32 %v277_v36, %v2129_v49  ;;  %v269_v49 = vmul.f32 %v1811_v43, %v2146_v61 }
 0x2dc   :  { %v285_v39 = vmax.f32 %v282_v37, 1e-08  ;;  %v272_v57 = vadd.f32 1.1, %v269_v49 }
 0x2dd   :  { %v279_v40 = vpop.xlane.xlu1 %278 }
 0x2de   :  { %1812 = vrcp.f32 %v285_v39  ;;  %v283_v41 = vsub.f32 %v279_v40, %v2136_v54  ;;  %v290_v62 = vmul.f32 %v272_v57, %v272_v57  ;;  %v1745_v20 = vpack.i.bf16 %v272_v57, %v271_v48 }
 0x2df   :  { %v499_v57 = vstv %s1353_s0 }
 0x2e0   :  { %v286_v44 = vmax.f32 %v283_v41, 1e-08  ;;  %v1352_v5 = vadd.f32 -1.0, %v290_v62 }
 0x2e1   :  { %v281_v45 = vpop.xlane.xlu0 %280 }
 0x2e2   :  { %1814 = vrcp.f32 %v286_v44  ;;  %v284_v47 = vsub.f32 %v281_v45, %v2143_v58 }
 0x2e4   :  { %v287_v51 = vmax.f32 %v284_v47, 1e-08 }
 0x2e6   :  { %1816 = vrcp.f32 %v287_v51 }
 0x2e8   :  { %v1813_v54 = vpop.eup %1812 }
 0x2e9   :  { %v297_v59 = vmul.f32 %v1813_v54, %v1350_v55  ;;  %v342_v23 = vpop.permute.xlu0 %341 }
 0x2eb   :  { %1818 = vrsqrt.f32 %v297_v59  ;;  %vm302_vm14 = vcmp.eq.f32.partialorder %v297_v59, inf  ;;  %v305_v61 = vand.u32 2147483648, %v297_v59  ;;  %vm304_vm15 = vcmp.eq.f32.partialorder %v297_v59, 0.0 }
 0x2ec   :  { %v1815_v63 = vpop.eup %1814 }
 0x2ed   :  { %v298_v4 = vmul.f32 %v1815_v63, %v1351_v60 }
 0x2ef   :  { %1820 = vrsqrt.f32 %v298_v4  ;;  %vm309_vm0 = vcmp.eq.f32.partialorder %v298_v4, inf  ;;  %v312_v11 = vand.u32 2147483648, %v298_v4  ;;  %vm311_vm1 = vcmp.eq.f32.partialorder %v298_v4, 0.0 }
 0x2f0   :  { %v1817_v58 = vpop.eup %1816 }
 0x2f1   :  { %v299_v0 = vmul.f32 %v1817_v58, %v1352_v5 }
 0x2f3   :  { %1822 = vrsqrt.f32 %v299_v0  ;;  %vm316_vm2 = vcmp.eq.f32.partialorder %v299_v0, inf  ;;  %v319_v17 = vand.u32 2147483648, %v299_v0  ;;  %vm318_vm3 = vcmp.eq.f32.partialorder %v299_v0, 0.0 }
 0x2f5   :  { %v1819_v3 = vpop.eup %1818 }
 0x2f6   :  { %v301_v1 = vmul.f32 %v1819_v3, %v297_v59 }
 0x2f8   :  { %v303_v2 = vsel %vm302_vm14, %v297_v59, %v301_v1  ;;  %vm620_vm14 = vcmask 261120  }
 0x2f9   :  { %v1821_v6 = vpop.eup %1820  ;;  %v306_v7 = vsel %vm304_vm15, %v305_v61, %v303_v2 }
 0x2fa   :  { %323 = vperm.xlu1 %1744, %v306_v7   ;;  %v308_v8 = vmul.f32 %v1821_v6, %v298_v4 }
 0x2fc   :  { %v310_v12 = vsel %vm309_vm0, %v298_v4, %v308_v8 }
 0x2fd   :  { %v1823_v14 = vpop.eup %1822  ;;  %v313_v15 = vsel %vm311_vm1, %v312_v11, %v310_v12 }
 0x2fe   :  { %328 = vperm.xlu1 %1744, %v313_v15   ;;  %v315_v16 = vmul.f32 %v1823_v14, %v299_v0 }
 0x300   :  { %v317_v18 = vsel %vm316_vm2, %v299_v0, %v315_v16 }
 0x301   :  { %v320_v19 = vsel %vm318_vm3, %v319_v17, %v317_v18 }
 0x302   :  { %333 = vperm.xlu1 %1744, %v320_v19  }
 0x306   :  { %1746 = vperm.xlu1 %1744, %v1745_v20  }
 0x379   :  { %v324_v21 = vpop.permute.xlu1 %323 }
 0x37a   :  { %v336_v22 = vmul.f32 %v324_v21, %v2124_v46 }
 0x37c   :  { %v354_v25 = vsel %vm48_vm7, %v342_v23, %v336_v22 }
 0x37d   :  { %v329_v26 = vpop.permute.xlu1 %328  ;;  %1545 = vmatmul.mubr.f32.vlgmr.msra.gmra.mrb[0].mxu1 %v354_v25 }
 0x37e   :  { %v337_v29 = vmul.f32 %v329_v26, %v2131_v52 }
 0x381   :  { %v334_v27 = vpop.permute.xlu1 %333 }
 0x382   :  { %v338_v30 = vmul.f32 %v334_v27, %v2138_v56 }
 0x385   :  { %v1747_v28 = vpop.permute.xlu1 %1746 }
 0x386   :  { %v1749_v31 = vunpack.i.h.bf16 %v1747_v28  ;;  %v1748_v32 = vunpack.i.l.bf16 %v1747_v28 }
 0x388   :  { %v355_v33 = vsel %vm48_vm7, %v1748_v32, %v337_v29  ;;  %v356_v46 = vsel %vm48_vm7, %v1749_v31, %v338_v30 }
 0x389   :  { %1547 = vmatprep.mubr.f32.mxu1 %v355_v33 }
 0x38a   :  { %1548 = vmatmul.mubr.f32.gmra.mrb[2].mxu1 %v356_v46 }
 0x450   :  { %v1546_v35 = vpop.f32.mrb[0].mxu1 }
 0x451   :  { %v2224_v36 = vadd.f32 %v1546_v35, %v1354_v34  ;;  %v460_v52 = vpop.f32.mrb[1].mxu1 }
 0x452   :  { %v2226_v37 = vadd.f32 %v1354_v34, %v460_v52 }
 0x453   :  { %v480_v56 = vsub.f32 0.0, %v2224_v36  ;;  %v509_v38 = vmul.f32 %v2224_v36, %v2224_v36 }
 0x454   :  { %v479_v39 = vsub.f32 0.0, %v2226_v37  ;;  %v508_v40 = vmul.f32 %v2226_v37, %v2226_v37 }
 0x455   :  { %v485_v41 = vmul.f32 1.442695, %v480_v56  ;;  %514 = vadd.xlane.f32.xlu0 %v509_v38 }
 0x456   :  { %v483_v42 = vmul.f32 1.442695, %v479_v39  ;;  %512 = vadd.xlane.f32.xlu1 %v508_v40 }
 0x457   :  { %1824 = vpow2.f32 %v485_v41 }
 0x458   :  { %1826 = vpow2.f32 %v483_v42 }
 0x45d   :  { %v1549_v43 = vpop.f32.mrb[2].mxu1 }
 0x45e   :  { %v470_v44 = vpop.f32.mrb[3].mxu1  ;;  %v2236_v48 = vadd.f32 %v1549_v43, %v1354_v34 }
 0x45f   :  { %v2234_v45 = vadd.f32 %v1354_v34, %v470_v44 }
 0x460   :  { %v511_v55 = vmul.f32 %v2236_v48, %v2236_v48  ;;  %v482_v0 = vsub.f32 0.0, %v2236_v48 }
 0x461   :  { %v1825_v47 = vpop.eup %1824  ;;  %v510_v50 = vmul.f32 %v2234_v45, %v2234_v45  ;;  %v481_v58 = vsub.f32 0.0, %v2234_v45 }
 0x462   :  { %v1827_v49 = vpop.eup %1826  ;;  %v492_v51 = vadd.f32 1.0, %v1825_v47  ;;  %v489_v1 = vmul.f32 1.442695, %v482_v0 }
 0x463   :  { %v491_v53 = vadd.f32 1.0, %v1827_v49  ;;  %516 = vadd.xlane.f32.xlu1 %v510_v50  ;;  %v487_v3 = vmul.f32 1.442695, %v481_v58 }
 0x464   :  { %1828 = vrcp.f32 %v492_v51 }
 0x465   :  { %1830 = vrcp.f32 %v491_v53 }
 0x466   :  { %1832 = vpow2.f32 %v487_v3 }
 0x467   :  { %518 = vadd.xlane.f32.xlu1 %v511_v55  ;;  %1834 = vpow2.f32 %v489_v1 }
 0x46e   :  { %v1829_v54 = vpop.eup %1828 }
 0x46f   :  { %v1831_v59 = vpop.eup %1830  ;;  %v501_v60 = vmul.f32 %v1829_v54, %v499_v57 }
 0x470   :  { %v500_v62 = vmul.f32 %v1831_v59, %v499_v57  ;;  %v1833_v61 = vpop.eup %1832 }
 0x471   :  { %v505_v4 = vadd.f32 1.1, %v501_v60  ;;  %v1835_v2 = vpop.eup %1834  ;;  %v493_v6 = vadd.f32 1.0, %v1833_v61 }
 0x472   :  { %v504_v63 = vadd.f32 1.1, %v500_v62  ;;  %v494_v7 = vadd.f32 1.0, %v1835_v2 }
 0x473   :  { %1836 = vrcp.f32 %v493_v6  ;;  %v529_v16 = vmul.f32 %v505_v4, %v505_v4  ;;  %v362_v6 = vld [vmem:[%s2450_s3] sm:$0xff] }
 0x474   :  { %v1750_v5 = vpack.i.bf16 %v505_v4, %v504_v63  ;;  %1838 = vrcp.f32 %v494_v7  ;;  %v528_v17 = vmul.f32 %v504_v63, %v504_v63  ;;  %1558 = vmatprep.mubr.msk.f32.mxu1 %vm620_vm14, %v362_v6 }
 0x475   :  { %v1356_v20 = vadd.f32 -1.0, %v529_v16 }
 0x476   :  { %v1355_v23 = vadd.f32 -1.0, %v528_v17 }
 0x478   :  { %1751 = vperm.xlu1 %1744, %v1750_v5  }
 0x47d   :  { %v1837_v18 = vpop.eup %1836 }
 0x47e   :  { %v1839_v19 = vpop.eup %1838  ;;  %v502_v28 = vmul.f32 %v1837_v18, %v499_v57 }
 0x47f   :  { %v503_v33 = vmul.f32 %v1839_v19, %v499_v57 }
 0x480   :  { %v506_v46 = vadd.f32 1.1, %v502_v28  ;;  %v2263_v28 = vld [vmem:[%s2450_s3 + $0x8] sm:$0xff] }
 0x481   :  { %v507_v35 = vadd.f32 1.1, %v503_v33 }
 0x482   :  { %v530_v52 = vmul.f32 %v506_v46, %v506_v46 }
 0x483   :  { %v531_v56 = vmul.f32 %v507_v35, %v507_v35  ;;  %v1755_v60 = vpack.i.bf16 %v507_v35, %v506_v46 }
 0x484   :  { %v1357_v39 = vadd.f32 -1.0, %v530_v52  ;;  %v1363_v52 = vld [vmem:[%s2454_s7 + $0x80] sm:$0xff] }
 0x485   :  { %v1358_v49 = vadd.f32 -1.0, %v531_v56  ;;  %v1364_v56 = vld [vmem:[%s2454_s7 + $0x88] sm:$0xff] }
 0x4e2   :  { %v515_v8 = vpop.xlane.xlu0 %514 }
 0x4e3   :  { %v521_v10 = vsub.f32 %v515_v8, %v509_v38  ;;  %v513_v11 = vpop.xlane.xlu1 %512 }
 0x4e4   :  { %v520_v12 = vsub.f32 %v513_v11, %v508_v40 }
 0x4e5   :  { %v525_v14 = vmax.f32 %v521_v10, 1e-08 }
 0x4e6   :  { %v524_v15 = vmax.f32 %v520_v12, 1e-08 }
 0x4e7   :  { %1840 = vrcp.f32 %v525_v14 }
 0x4e8   :  { %1842 = vrcp.f32 %v524_v15 }
 0x4f0   :  { %v517_v21 = vpop.xlane.xlu1 %516 }
 0x4f1   :  { %v1841_v22 = vpop.eup %1840  ;;  %v522_v25 = vsub.f32 %v517_v21, %v510_v50 }
 0x4f2   :  { %v1843_v26 = vpop.eup %1842  ;;  %v541_v27 = vmul.f32 %v1841_v22, %v1356_v20 }
 0x4f3   :  { %v540_v29 = vmul.f32 %v1843_v26, %v1355_v23  ;;  %v526_v30 = vmax.f32 %v522_v25, 1e-08 }
 0x4f4   :  { %v519_v31 = vpop.xlane.xlu1 %518  ;;  %1844 = vrsqrt.f32 %v541_v27  ;;  %vm553_vm4 = vcmp.eq.f32.partialorder %v541_v27, inf  ;;  %v556_v43 = vand.u32 2147483648, %v541_v27  ;;  %vm555_vm5 = vcmp.eq.f32.partialorder %v541_v27, 0.0 }
 0x4f5   :  { %1846 = vrcp.f32 %v526_v30  ;;  %v523_v32 = vsub.f32 %v519_v31, %v511_v55  ;;  %vm546_vm8 = vcmp.eq.f32.partialorder %v540_v29, inf  ;;  %v549_v53 = vand.u32 2147483648, %v540_v29 }
 0x4f6   :  { %1848 = vrsqrt.f32 %v540_v29  ;;  %vm548_vm9 = vcmp.eq.f32.partialorder %v540_v29, 0.0 }
 0x4f7   :  { %v527_v34 = vmax.f32 %v523_v32, 1e-08 }
 0x4f8   :  { %v1752_v7 = vpop.permute.xlu1 %1751 }
 0x4f9   :  { %1850 = vrcp.f32 %v527_v34  ;;  %v1754_v10 = vunpack.i.h.bf16 %v1752_v7  ;;  %v1753_v14 = vunpack.i.l.bf16 %v1752_v7 }
 0x4fe   :  { %v1845_v38 = vpop.eup %1844 }
 0x4ff   :  { %v1847_v40 = vpop.eup %1846  ;;  %v552_v41 = vmul.f32 %v1845_v38, %v541_v27  ;;  %v1365_v38 = vld [vmem:[%s2454_s7 + $0x90] sm:$0xff] }
 0x500   :  { %v1849_v42 = vpop.eup %1848  ;;  %v542_v44 = vmul.f32 %v1847_v40, %v1357_v39  ;;  %v1691_v39 = vpack.c.bf16 %v1364_v56, %v1363_v52  ;;  %v1366_v40 = vld [vmem:[%s2454_s7 + $0x98] sm:$0xff] }
 0x501   :  { %v554_v47 = vsel %vm553_vm4, %v541_v27, %v552_v41  ;;  %v545_v50 = vmul.f32 %v1849_v42, %v540_v29  ;;  %v1695_v41 = vpack.c.bf16 %v1366_v40, %v1365_v38  ;;  %v1367_v42 = vld [vmem:[%s2454_s7 + $0xa0] sm:$0xff] }
 0x502   :  { %v557_v51 = vsel %vm555_vm5, %v556_v43, %v554_v47  ;;  %1852 = vrsqrt.f32 %v542_v44  ;;  %vm560_vm10 = vcmp.eq.f32.partialorder %v542_v44, inf  ;;  %v563_v4 = vand.u32 2147483648, %v542_v44  ;;  %v1368_v43 = vld [vmem:[%s2454_s7 + $0xa8] sm:$0xff]  ;;  %1692 = vmatprep.subr.bf16.mxu0 %v1691_v39  ;;  %v1369_v47 = vld [vmem:[%s2454_s7 + $0xb0] sm:$0xff] }
 0x503   :  { %v1851_v55 = vpop.eup %1850  ;;  %579 = vperm.xlu0 %1743, %v557_v51   ;;  %v547_v57 = vsel %vm546_vm8, %v540_v29, %v545_v50  ;;  %vm562_vm11 = vcmp.eq.f32.partialorder %v542_v44, 0.0  ;;  %1694 = vmatpush3.bf16.msra.mxu0 %v1691_v39  ;;  %v1370_v50 = vld [vmem:[%s2454_s7 + $0xb8] sm:$0xff]  ;;  %v1371_v51 = vld [vmem:[%s2454_s7 + $0xc0] sm:$0xff] }
 0x504   :  { %v550_v54 = vsel %vm548_vm9, %v549_v53, %v547_v57  ;;  %v543_v59 = vmul.f32 %v1851_v55, %v1358_v49  ;;  %1696 = vmatprep.subr.bf16.mxu0 %v1695_v41  ;;  %v1703_v49 = vpack.c.bf16 %v1370_v50, %v1369_v47  ;;  %v1372_v53 = vld [vmem:[%s2454_s7 + $0xc8] sm:$0xff]  ;;  %v1373_v57 = vld [vmem:[%s2454_s7 + $0xd0] sm:$0xff] }
 0x505   :  { %574 = vperm.xlu1 %1744, %v550_v54   ;;  %v1707_v55 = vpack.c.bf16 %v1372_v53, %v1371_v51  ;;  %v1374_v54 = vld [vmem:[%s2454_s7 + $0xd8] sm:$0xff]  ;;  %v1377_v53 = vld [vmem:[%s2454_s7 + $0xf0] sm:$0xff] }
 0x506   :  { %1854 = vrsqrt.f32 %v543_v59  ;;  %vm567_vm12 = vcmp.eq.f32.partialorder %v543_v59, inf  ;;  %v570_v1 = vand.u32 2147483648, %v543_v59  ;;  %vm569_vm13 = vcmp.eq.f32.partialorder %v543_v59, 0.0 }
 0x507   :  { %1756 = vperm.xlu0 %1743, %v1755_v60   ;;  %1698 = vmatpush3.bf16.msra.mxu0 %v1695_v41  ;;  %v1375_v60 = vld [vmem:[%s2454_s7 + $0xe0] sm:$0xff] }
 0x50c   :  { %v1853_v62 = vpop.eup %1852 }
 0x50d   :  { %v559_v63 = vmul.f32 %v1853_v62, %v542_v44  ;;  %v1376_v62 = vld [vmem:[%s2454_s7 + $0xe8] sm:$0xff] }
 0x50f   :  { %v561_v5 = vsel %vm560_vm10, %v542_v44, %v559_v63  ;;  %v1699_v44 = vpack.c.bf16 %v1368_v43, %v1367_v42  ;;  %v1715_v63 = vpack.c.bf16 %v1376_v62, %v1375_v60 }
 0x510   :  { %v1855_v58 = vpop.eup %1854  ;;  %v564_v0 = vsel %vm562_vm11, %v563_v4, %v561_v5 }
 0x511   :  { %584 = vperm.xlu1 %1744, %v564_v0   ;;  %v566_v3 = vmul.f32 %v1855_v58, %v543_v59  ;;  %1700 = vmatprep.subr.bf16.mxu0 %v1699_v44 }
 0x512   :  { %1702 = vmatpush3.bf16.msra.mxu0 %v1699_v44 }
 0x513   :  { %v568_v61 = vsel %vm567_vm12, %v543_v59, %v566_v3  ;;  %1704 = vmatprep.subr.bf16.mxu0 %v1703_v49  ;;  %v1711_v59 = vpack.c.bf16 %v1374_v54, %v1373_v57 }
 0x514   :  { %v571_v2 = vsel %vm569_vm13, %v570_v1, %v568_v61 }
 0x515   :  { %589 = vperm.xlu1 %1744, %v571_v2  }
 0x516   :  { %1706 = vmatpush3.bf16.msra.mxu0 %v1703_v49 }
 0x517   :  { %1708 = vmatprep.subr.bf16.mxu0 %v1707_v55 }
 0x51a   :  { %1710 = vmatpush3.bf16.msra.mxu0 %v1707_v55  ;;  %v1378_v55 = vld [vmem:[%s2454_s7 + $0xf8] sm:$0xff] }
 0x51b   :  { %1712 = vmatprep.subr.bf16.mxu0 %v1711_v59  ;;  %v1719_v57 = vpack.c.bf16 %v1378_v55, %v1377_v53 }
 0x51e   :  { %1714 = vmatpush3.bf16.msra.mxu0 %v1711_v59 }
 0x51f   :  { %1716 = vmatprep.subr.bf16.mxu0 %v1715_v63 }
 0x522   :  { %1718 = vmatpush3.bf16.msra.mxu0 %v1715_v63 }
 0x523   :  { %1720 = vmatprep.subr.bf16.mxu0 %v1719_v57 }
 0x526   :  { %1722 = vmatpush3.bf16.msra.mxu0 %v1719_v57 }
 0x582   :  { %v580_v8 = vpop.permute.xlu0 %579 }
 0x583   :  { %v593_v11 = vmul.f32 %v580_v8, %v2224_v36 }
 0x584   :  { %v575_v12 = vpop.permute.xlu1 %574 }
 0x585   :  { %v592_v15 = vmul.f32 %v575_v12, %v2226_v37  ;;  %v617_v16 = vsel %vm48_vm7, %v1754_v10, %v593_v11 }
 0x586   :  { %v1757_v20 = vpop.permute.xlu0 %1756 }
 0x587   :  { %v616_v17 = vsel %vm48_vm7, %v1753_v14, %v592_v15  ;;  %v1759_v23 = vunpack.i.h.bf16 %v1757_v20  ;;  %v1758_v36 = vunpack.i.l.bf16 %v1757_v20 }
 0x588   :  { %v1683_v18 = vpack.c.bf16 %v617_v16, %v616_v17 }
 0x58a   :  { %1684 = vmatprep.subr.bf16.mxu1 %v1683_v18 }
 0x58b   :  { %1686 = vmatpush3.bf16.msra.mxu1 %v1683_v18 }
 0x590   :  { %v585_v19 = vpop.permute.xlu1 %584 }
 0x591   :  { %v594_v21 = vmul.f32 %v585_v19, %v2234_v45  ;;  %v2268_v45 = vld [vmem:[%s2450_s3 + $0x10] sm:$0xff] }
 0x593   :  { %v618_v37 = vsel %vm48_vm7, %v1758_v36, %v594_v21 }
 0x594   :  { %v590_v22 = vpop.permute.xlu1 %589 }
 0x595   :  { %v595_v25 = vmul.f32 %v590_v22, %v2236_v48  ;;  %v2277_v48 = vld [vmem:[%s2450_s3 + $0x18] sm:$0xff] }
 0x597   :  { %v619_v26 = vsel %vm48_vm7, %v1759_v23, %v595_v25 }
 0x598   :  { %v1687_v27 = vpack.c.bf16 %v619_v26, %v618_v37 }
 0x59a   :  { %1688 = vmatprep.subr.bf16.mxu1 %v1687_v27 }
 0x59b   :  { %1690 = vmatpush3.bf16.msra.mxu1 %v1687_v27 }
 0x59e   :  { %1559 = vmatmul.mubr.msk.f32.vlgmr.msra.gmra.mrb[4].mxu1 %vm620_vm14, %v2263_v28 }
 0x59f   :  { %1561 = vmatprep.mubr.msk.f32.mxu1 %vm620_vm14, %v2268_v45 }
 0x5a2   :  { %1562 = vmatmul.mubr.msk.f32.gmra.mrb[6].mxu1 %vm620_vm14, %v2277_v48 }
 0x5a3   :  { %1610 = vmatprep.mubr.msk.f32.mxu1 %vm620_vm14, %v362_v6 }
 0x671   :  { %v2282_v29 = vpop.f32.mrb[4].mxu1 }
 0x672   :  { %v2284_v30 = vpop.f32.mrb[5].mxu1  ;;  %v719_v31 = vmul.f32 %v2282_v29, %v2282_v29  ;;  %v731_v4 = vmul.f32 2.0, %v2282_v29 }
 0x673   :  { %v718_v32 = vmul.f32 %v2284_v30, %v2284_v30  ;;  %v730_v5 = vmul.f32 2.0, %v2284_v30 }
 0x674   :  { %724 = vadd.xlane.f32.xlu0 %v719_v31  ;;  %v735_v58 = vmul.f32 %v2282_v29, %v731_v4 }
 0x675   :  { %722 = vadd.xlane.f32.xlu1 %v718_v32  ;;  %v2290_v33 = vpop.f32.mrb[6].mxu1  ;;  %v734_v3 = vmul.f32 %v730_v5, %v2284_v30 }
 0x676   :  { %v2292_v46 = vpop.f32.mrb[7].mxu1  ;;  %v721_v34 = vmul.f32 %v2290_v33, %v2290_v33  ;;  %v733_v1 = vmul.f32 2.0, %v2290_v33 }
 0x677   :  { %v720_v35 = vmul.f32 %v2292_v46, %v2292_v46  ;;  %v732_v61 = vmul.f32 2.0, %v2292_v46 }
 0x678   :  { %v737_v11 = vmul.f32 %v2290_v33, %v733_v1 }
 0x679   :  { %728 = vadd.xlane.f32.xlu1 %v721_v34  ;;  %726 = vadd.xlane.f32.xlu0 %v720_v35  ;;  %v736_v12 = vmul.f32 %v732_v61, %v2292_v46 }
 0x701   :  { %v725_v0 = vpop.xlane.xlu0 %724 }
 0x702   :  { %v739_v2 = vsub.f32 %v725_v0, %v735_v58  ;;  %v723_v6 = vpop.xlane.xlu1 %722 }
 0x703   :  { %v738_v7 = vsub.f32 %v723_v6, %v734_v3 }
 0x704   :  { %v743_v8 = vand.u32 2147483647, %v739_v2 }
 0x705   :  { %v742_v10 = vand.u32 2147483647, %v738_v7 }
 0x706   :  { %v747_v14 = vmax.f32 %v743_v8, 1e-08  ;;  %v729_v15 = vpop.xlane.xlu1 %728  ;;  %v727_v16 = vpop.xlane.xlu0 %726 }
 0x707   :  { %v746_v17 = vmax.f32 %v742_v10, 1e-08  ;;  %v741_v18 = vsub.f32 %v729_v15, %v737_v11  ;;  %v740_v19 = vsub.f32 %v727_v16, %v736_v12 }
 0x708   :  { %1856 = vrsqrt.f32 %v747_v14  ;;  %vm759_vm15 = vcmp.eq.f32.partialorder %v747_v14, inf  ;;  %v762_v26 = vand.u32 2147483648, %v747_v14  ;;  %vm761_vm0 = vcmp.eq.f32.partialorder %v747_v14, 0.0 }
 0x709   :  { %1858 = vrsqrt.f32 %v746_v17  ;;  %v745_v20 = vand.u32 2147483647, %v741_v18  ;;  %v744_v21 = vand.u32 2147483647, %v740_v19  ;;  %vm752_vm1 = vcmp.eq.f32.partialorder %v746_v17, inf }
 0x70a   :  { %v755_v32 = vand.u32 2147483648, %v746_v17  ;;  %vm754_vm2 = vcmp.eq.f32.partialorder %v746_v17, 0.0 }
 0x70b   :  { %v749_v22 = vmax.f32 %v745_v20, 1e-08  ;;  %v748_v23 = vmax.f32 %v744_v21, 1e-08 }
 0x70d   :  { %1860 = vrsqrt.f32 %v749_v22  ;;  %vm773_vm3 = vcmp.eq.f32.partialorder %v749_v22, inf  ;;  %v776_v40 = vand.u32 2147483648, %v749_v22  ;;  %vm775_vm4 = vcmp.eq.f32.partialorder %v749_v22, 0.0 }
 0x70e   :  { %1862 = vrsqrt.f32 %v748_v23  ;;  %vm766_vm5 = vcmp.eq.f32.partialorder %v748_v23, inf  ;;  %v769_v43 = vand.u32 2147483648, %v748_v23  ;;  %vm768_vm8 = vcmp.eq.f32.partialorder %v748_v23, 0.0 }
 0x712   :  { %v1857_v36 = vpop.eup %1856 }
 0x713   :  { %v1859_v25 = vpop.eup %1858  ;;  %v758_v37 = vmul.f32 %v1857_v36, %v747_v14 }
 0x714   :  { %v751_v27 = vmul.f32 %v1859_v25, %v746_v17 }
 0x715   :  { %v760_v31 = vsel %vm759_vm15, %v747_v14, %v758_v37 }
 0x716   :  { %v763_v34 = vsel %vm761_vm0, %v762_v26, %v760_v31  ;;  %v753_v35 = vsel %vm752_vm1, %v746_v17, %v751_v27 }
 0x717   :  { %1864 = vrcp.f32 %v763_v34  ;;  %v756_v52 = vsel %vm754_vm2, %v755_v32, %v753_v35  ;;  %v1861_v56 = vpop.eup %1860 }
 0x718   :  { %1866 = vrcp.f32 %v756_v52  ;;  %v1863_v38 = vpop.eup %1862  ;;  %v772_v39 = vmul.f32 %v1861_v56, %v749_v22 }
 0x719   :  { %v765_v41 = vmul.f32 %v1863_v38, %v748_v23 }
 0x71a   :  { %v774_v42 = vsel %vm773_vm3, %v749_v22, %v772_v39 }
 0x71b   :  { %v777_v44 = vsel %vm775_vm4, %v776_v40, %v774_v42  ;;  %v767_v47 = vsel %vm766_vm5, %v748_v23, %v765_v41 }
 0x71c   :  { %1868 = vrcp.f32 %v777_v44  ;;  %v770_v50 = vsel %vm768_vm8, %v769_v43, %v767_v47 }
 0x71d   :  { %1870 = vrcp.f32 %v770_v50 }
 0x721   :  { %v1865_v49 = vpop.eup %1864 }
 0x722   :  { %v1867_v51 = vpop.eup %1866  ;;  %789 = vperm.xlu1 %1744, %v1865_v49  }
 0x723   :  { %784 = vperm.xlu0 %1743, %v1867_v51  }
 0x726   :  { %v1869_v54 = vpop.eup %1868 }
 0x727   :  { %v1871_v59 = vpop.eup %1870  ;;  %799 = vperm.xlu0 %1743, %v1869_v54  }
 0x728   :  { %794 = vperm.xlu1 %1744, %v1871_v59  }
 0x7a1   :  { %v790_v60 = vpop.permute.xlu1 %789 }
 0x7a2   :  { %v803_v62 = vmul.f32 %v2282_v29, %v790_v60  ;;  %v785_v63 = vpop.permute.xlu0 %784  ;;  %v1381_v29 = vld [vmem:[%s2455_s8 + $0x1] ss:$0 sm:$0xff]  ;;  %s1380_s8 = sld [smem:[#allocation3 + $0x2]] }
 0x7a3   :  { %v802_v4 = vmul.f32 %v785_v63, %v2284_v30 }
 0x7a4   :  { %v827_v58 = vmax.f32 %v803_v62, 0.0 }
 0x7a5   :  { %v826_v5 = vmax.f32 %v802_v4, 0.0 }
 0x7a6   :  { %v800_v0 = vpop.permute.xlu0 %799 }
 0x7a7   :  { %1596 = vmatprep.mubr.f32.mxu0 %v826_v5  ;;  %v795_v3 = vpop.permute.xlu1 %794  ;;  %v805_v1 = vmul.f32 %v2290_v33, %v800_v0 }
 0x7a8   :  { %1597 = vmatmul.mubr.f32.vlgmr.msra.gmra.mrb[6].mxu0 %v827_v58  ;;  %v804_v61 = vmul.f32 %v795_v3, %v2292_v46  ;;  %v941_v37 = vstv %s1380_s8 }
 0x7a9   :  { %v829_v2 = vmax.f32 %v805_v1, 0.0 }
 0x7aa   :  { %v828_v6 = vmax.f32 %v804_v61, 0.0 }
 0x7ac   :  { %1599 = vmatprep.mubr.f32.mxu0 %v828_v6 }
 0x7ad   :  { %1600 = vmatmul.mubr.f32.gmra.mrb[8].mxu0 %v829_v2 }
 0x87b   :  { %v1598_v7 = vpop.f32.mrb[6].mxu0 }
 0x87c   :  { %v2361_v30 = vadd.f32 %v1598_v7, %v1381_v29  ;;  %v902_v8 = vpop.f32.mrb[7].mxu0 }
 0x87d   :  { %v2363_v10 = vadd.f32 %v1381_v29, %v902_v8 }
 0x87e   :  { %v922_v11 = vsub.f32 0.0, %v2361_v30  ;;  %v951_v33 = vmul.f32 %v2361_v30, %v2361_v30 }
 0x87f   :  { %v921_v46 = vsub.f32 0.0, %v2363_v10  ;;  %v950_v12 = vmul.f32 %v2363_v10, %v2363_v10 }
 0x880   :  { %v927_v14 = vmul.f32 1.442695, %v922_v11  ;;  %956 = vadd.xlane.f32.xlu0 %v951_v33  ;;  %v1601_v16 = vpop.f32.mrb[8].mxu0 }
 0x881   :  { %v925_v15 = vmul.f32 1.442695, %v921_v46  ;;  %954 = vadd.xlane.f32.xlu1 %v950_v12  ;;  %v2371_v17 = vadd.f32 %v1601_v16, %v1381_v29  ;;  %v912_v18 = vpop.f32.mrb[9].mxu0 }
 0x882   :  { %1872 = vpow2.f32 %v927_v14  ;;  %v2373_v19 = vadd.f32 %v1381_v29, %v912_v18 }
 0x883   :  { %1874 = vpow2.f32 %v925_v15  ;;  %v953_v20 = vmul.f32 %v2371_v17, %v2371_v17  ;;  %v924_v56 = vsub.f32 0.0, %v2371_v17 }
 0x884   :  { %v952_v21 = vmul.f32 %v2373_v19, %v2373_v19  ;;  %v923_v38 = vsub.f32 0.0, %v2373_v19 }
 0x885   :  { %960 = vadd.xlane.f32.xlu1 %v953_v20  ;;  %v931_v39 = vmul.f32 1.442695, %v924_v56 }
 0x886   :  { %958 = vadd.xlane.f32.xlu0 %v952_v21  ;;  %v929_v40 = vmul.f32 1.442695, %v923_v38 }
 0x88c   :  { %v1873_v22 = vpop.eup %1872 }
 0x88d   :  { %v1875_v23 = vpop.eup %1874  ;;  %v934_v36 = vadd.f32 1.0, %v1873_v22 }
 0x88e   :  { %v933_v25 = vadd.f32 1.0, %v1875_v23 }
 0x88f   :  { %1876 = vrcp.f32 %v934_v36 }
 0x890   :  { %1878 = vrcp.f32 %v933_v25 }
 0x891   :  { %1880 = vpow2.f32 %v931_v39 }
 0x892   :  { %1882 = vpow2.f32 %v929_v40 }
 0x899   :  { %v1877_v26 = vpop.eup %1876 }
 0x89a   :  { %v1879_v27 = vpop.eup %1878  ;;  %v943_v31 = vmul.f32 %v1877_v26, %v941_v37 }
 0x89b   :  { %v942_v32 = vmul.f32 %v1879_v27, %v941_v37  ;;  %v1881_v41 = vpop.eup %1880 }
 0x89c   :  { %v947_v34 = vadd.f32 1.1, %v943_v31  ;;  %v1883_v42 = vpop.eup %1882  ;;  %v936_v43 = vadd.f32 1.0, %v1881_v41 }
 0x89d   :  { %v946_v35 = vadd.f32 1.1, %v942_v32  ;;  %v935_v44 = vadd.f32 1.0, %v1883_v42 }
 0x89e   :  { %1884 = vrcp.f32 %v936_v43  ;;  %v971_v0 = vmul.f32 %v947_v34, %v947_v34 }
 0x89f   :  { %v1760_v52 = vpack.i.bf16 %v947_v34, %v946_v35  ;;  %1886 = vrcp.f32 %v935_v44  ;;  %v970_v1 = vmul.f32 %v946_v35, %v946_v35 }
 0x8a0   :  { %v1383_v6 = vadd.f32 -1.0, %v971_v0 }
 0x8a1   :  { %1761 = vperm.xlu1 %1744, %v1760_v52   ;;  %v1382_v7 = vadd.f32 -1.0, %v970_v1 }
 0x8a8   :  { %v1885_v57 = vpop.eup %1884 }
 0x8a9   :  { %v1887_v54 = vpop.eup %1886  ;;  %v945_v63 = vmul.f32 %v1885_v57, %v941_v37 }
 0x8aa   :  { %v944_v5 = vmul.f32 %v1887_v54, %v941_v37 }
 0x8ab   :  { %v949_v61 = vadd.f32 1.1, %v945_v63 }
 0x8ac   :  { %v948_v2 = vadd.f32 1.1, %v944_v5 }
 0x90d   :  { %v957_v47 = vpop.xlane.xlu0 %956 }
 0x90e   :  { %v963_v50 = vsub.f32 %v957_v47, %v951_v33  ;;  %v955_v49 = vpop.xlane.xlu1 %954  ;;  %v973_v33 = vmul.f32 %v949_v61, %v949_v61  ;;  %v1765_v47 = vpack.i.bf16 %v949_v61, %v948_v2 }
 0x90f   :  { %v962_v51 = vsub.f32 %v955_v49, %v950_v12  ;;  %v972_v12 = vmul.f32 %v948_v2, %v948_v2 }
 0x910   :  { %v967_v53 = vmax.f32 %v963_v50, 1e-08  ;;  %v1385_v14 = vadd.f32 -1.0, %v973_v33 }
 0x911   :  { %v966_v55 = vmax.f32 %v962_v51, 1e-08  ;;  %v1384_v16 = vadd.f32 -1.0, %v972_v12 }
 0x912   :  { %1888 = vrcp.f32 %v967_v53  ;;  %v961_v59 = vpop.xlane.xlu1 %960 }
 0x913   :  { %1890 = vrcp.f32 %v966_v55  ;;  %v959_v60 = vpop.xlane.xlu0 %958  ;;  %v965_v62 = vsub.f32 %v961_v59, %v953_v20 }
 0x914   :  { %v964_v4 = vsub.f32 %v959_v60, %v952_v21 }
 0x915   :  { %v969_v58 = vmax.f32 %v965_v62, 1e-08 }
 0x916   :  { %v968_v3 = vmax.f32 %v964_v4, 1e-08 }
 0x917   :  { %1892 = vrcp.f32 %v969_v58 }
 0x918   :  { %1894 = vrcp.f32 %v968_v3 }
 0x91c   :  { %v1889_v29 = vpop.eup %1888 }
 0x91d   :  { %v1891_v8 = vpop.eup %1890  ;;  %v983_v11 = vmul.f32 %v1889_v29, %v1383_v6 }
 0x91e   :  { %v982_v46 = vmul.f32 %v1891_v8, %v1382_v7 }
 0x91f   :  { %1896 = vrsqrt.f32 %v983_v11  ;;  %vm995_vm9 = vcmp.eq.f32.partialorder %v983_v11, inf  ;;  %v998_v25 = vand.u32 2147483648, %v983_v11  ;;  %vm997_vm10 = vcmp.eq.f32.partialorder %v983_v11, 0.0 }
 0x920   :  { %1898 = vrsqrt.f32 %v982_v46  ;;  %vm988_vm11 = vcmp.eq.f32.partialorder %v982_v46, inf  ;;  %v991_v27 = vand.u32 2147483648, %v982_v46  ;;  %vm990_vm12 = vcmp.eq.f32.partialorder %v982_v46, 0.0  ;;  %v1762_v50 = vpop.permute.xlu1 %1761 }
 0x921   :  { %v1893_v15 = vpop.eup %1892  ;;  %v1764_v51 = vunpack.i.h.bf16 %v1762_v50  ;;  %v1763_v57 = vunpack.i.l.bf16 %v1762_v50 }
 0x922   :  { %v1895_v18 = vpop.eup %1894  ;;  %v985_v20 = vmul.f32 %v1893_v15, %v1385_v14 }
 0x923   :  { %v984_v21 = vmul.f32 %v1895_v18, %v1384_v16 }
 0x924   :  { %1900 = vrsqrt.f32 %v985_v20  ;;  %vm1009_vm13 = vcmp.eq.f32.partialorder %v985_v20, inf  ;;  %v1012_v38 = vand.u32 2147483648, %v985_v20  ;;  %vm1011_vm15 = vcmp.eq.f32.partialorder %v985_v20, 0.0 }
 0x925   :  { %1902 = vrsqrt.f32 %v984_v21  ;;  %vm1002_vm0 = vcmp.eq.f32.partialorder %v984_v21, inf  ;;  %v1005_v41 = vand.u32 2147483648, %v984_v21  ;;  %vm1004_vm1 = vcmp.eq.f32.partialorder %v984_v21, 0.0 }
 0x929   :  { %v1897_v22 = vpop.eup %1896 }
 0x92a   :  { %v1899_v23 = vpop.eup %1898  ;;  %v994_v36 = vmul.f32 %v1897_v22, %v983_v11 }
 0x92b   :  { %v987_v37 = vmul.f32 %v1899_v23, %v982_v46 }
 0x92c   :  { %v996_v26 = vsel %vm995_vm9, %v983_v11, %v994_v36 }
 0x92d   :  { %v999_v31 = vsel %vm997_vm10, %v998_v25, %v996_v26  ;;  %v989_v32 = vsel %vm988_vm11, %v982_v46, %v987_v37  ;;  %vm1310_vm10 = vcmask 1041408  }
 0x92e   :  { %1021 = vperm.xlu1 %1744, %v999_v31   ;;  %v992_v34 = vsel %vm990_vm12, %v991_v27, %v989_v32  ;;  %v1901_v35 = vpop.eup %1900 }
 0x92f   :  { %1016 = vperm.xlu0 %1743, %v992_v34   ;;  %v1903_v52 = vpop.eup %1902  ;;  %v1008_v56 = vmul.f32 %v1901_v35, %v985_v20 }
 0x930   :  { %v1001_v39 = vmul.f32 %v1903_v52, %v984_v21 }
 0x931   :  { %v1010_v40 = vsel %vm1009_vm13, %v985_v20, %v1008_v56 }
 0x932   :  { %v1013_v42 = vsel %vm1011_vm15, %v1012_v38, %v1010_v40  ;;  %v1003_v43 = vsel %vm1002_vm0, %v984_v21, %v1001_v39 }
 0x933   :  { %1031 = vperm.xlu1 %1744, %v1013_v42   ;;  %v1006_v44 = vsel %vm1004_vm1, %v1005_v41, %v1003_v43 }
 0x934   :  { %1026 = vperm.xlu0 %1743, %v1006_v44  }
 0x938   :  { %1766 = vperm.xlu0 %1743, %v1765_v47  }
 0x9ad   :  { %v1022_v49 = vpop.permute.xlu1 %1021 }
 0x9ae   :  { %v1035_v53 = vmul.f32 %v1022_v49, %v2361_v30  ;;  %v1017_v55 = vpop.permute.xlu0 %1016 }
 0x9af   :  { %v1034_v54 = vmul.f32 %v1017_v55, %v2363_v10 }
 0x9b0   :  { %v1059_v59 = vsel %vm48_vm7, %v1764_v51, %v1035_v53 }
 0x9b1   :  { %v1058_v60 = vsel %vm48_vm7, %v1763_v57, %v1034_v54 }
 0x9b2   :  { %v1723_v62 = vpack.c.bf16 %v1059_v59, %v1058_v60  ;;  %v1032_v4 = vpop.permute.xlu1 %1031 }
 0x9b3   :  { %v1027_v63 = vpop.permute.xlu0 %1026  ;;  %v1037_v58 = vmul.f32 %v1032_v4, %v2371_v17 }
 0x9b4   :  { %1724 = vmatprep.subr.bf16.mxu1 %v1723_v62  ;;  %v1036_v30 = vmul.f32 %v1027_v63, %v2373_v19 }
 0x9b5   :  { %1726 = vmatpush3.bf16.msra.mxu1 %v1723_v62 }
 0x9b7   :  { %v1767_v5 = vpop.permute.xlu0 %1766 }
 0x9b8   :  { %v1769_v0 = vunpack.i.h.bf16 %v1767_v5  ;;  %v1768_v3 = vunpack.i.l.bf16 %v1767_v5 }
 0x9ba   :  { %v1060_v10 = vsel %vm48_vm7, %v1768_v3, %v1036_v30  ;;  %v1061_v1 = vsel %vm48_vm7, %v1769_v0, %v1037_v58 }
 0x9bb   :  { %v1727_v61 = vpack.c.bf16 %v1061_v1, %v1060_v10 }
 0x9bd   :  { %1728 = vmatprep.subr.bf16.mxu1 %v1727_v61 }
 0x9be   :  { %1730 = vmatpush3.bf16.msra.mxu1 %v1727_v61 }
 0x9bf   :  { %1731 = vmatprep.subr.bf16.mxu1 %v1963_v9 }
 0x9c1   :  { %1611 = vmatmul.mubr.msk.f32.vlgmr.msra.gmra.mrb[8].mxu1 %vm620_vm14, %v2263_v28 }
 0x9c2   :  { %1613 = vmatprep.mubr.msk.f32.mxu1 %vm620_vm14, %v2268_v45 }
 0x9c5   :  { %1614 = vmatmul.mubr.msk.f32.gmra.mrb[10].mxu1 %vm620_vm14, %v2277_v48 }
 0x9c6   :  { %1624 = vmatprep.mubr.msk.f32.mxu1 %vm1964_vm6, %v1965_v13 }
 0xa94   :  { %v2402_v17 = vpop.f32.mrb[8].mxu1 }
 0xa95   :  { %v2404_v24 = vpop.f32.mrb[9].mxu1  ;;  %v1148_v19 = vmul.f32 %v2402_v17, %v2402_v17  ;;  %v1160_v6 = vmul.f32 2.0, %v2402_v17 }
 0xa96   :  { %v1147_v2 = vmul.f32 %v2404_v24, %v2404_v24  ;;  %v1159_v29 = vmul.f32 2.0, %v2404_v24 }
 0xa97   :  { %1153 = vadd.xlane.f32.xlu0 %v1148_v19  ;;  %v1164_v7 = vmul.f32 %v2402_v17, %v1160_v6 }
 0xa98   :  { %1151 = vadd.xlane.f32.xlu1 %v1147_v2  ;;  %v2410_v28 = vpop.f32.mrb[10].mxu1  ;;  %v1163_v11 = vmul.f32 %v1159_v29, %v2404_v24 }
 0xa99   :  { %v2412_v45 = vpop.f32.mrb[11].mxu1  ;;  %v1150_v48 = vmul.f32 %v2410_v28, %v2410_v28  ;;  %v1162_v33 = vmul.f32 2.0, %v2410_v28 }
 0xa9a   :  { %v1149_v13 = vmul.f32 %v2412_v45, %v2412_v45  ;;  %v1161_v46 = vmul.f32 2.0, %v2412_v45 }
 0xa9b   :  { %v1166_v20 = vmul.f32 %v2410_v28, %v1162_v33 }
 0xa9c   :  { %1157 = vadd.xlane.f32.xlu1 %v1150_v48  ;;  %1155 = vadd.xlane.f32.xlu0 %v1149_v13  ;;  %v1165_v21 = vmul.f32 %v1161_v46, %v2412_v45  ;;  %v1235_v13 = vld [vmem:[%s2451_s4] sm:$0x3]  ;;  %s1967_s4 = smov [#allocation6]  }
 0xa9d   :  { %s1340_s29 = sshll.u32 %s1967_s4, 4  ;;  %s1341_s29 = int_to_ptr.vmem [resolvable:$true] %s1340_s29 }
 0xa9e   :  { %s1936_s30 = scalar_lea.vmem %s1341_s29, 32  ;;  %p1941_p6 = scmp.lt.s32.totalorder %s1341_s29, %s1341_s29 }
 0xa9f   :  { %p1937_p5 = scmp.ne.s32.totalorder %s1341_s29, %s1936_s30  ;;  %p1942_p7 = scmp.lt.s32.totalorder %s1936_s30, %s1936_s30 }
 0xaa1   :  { %p1943_p8 = por %p1942_p7, %p1941_p6 }
 0xaa3   :  { %p1944_p9 = pnand %p1943_p8, %p1937_p5 }
 0xb24   :  { %v1154_v8 = vpop.xlane.xlu0 %1153 }
 0xb25   :  { %v1168_v12 = vsub.f32 %v1154_v8, %v1164_v7  ;;  %v1152_v14 = vpop.xlane.xlu1 %1151 }
 0xb26   :  { %v1167_v15 = vsub.f32 %v1152_v14, %v1163_v11 }
 0xb27   :  { %v1172_v16 = vand.u32 2147483647, %v1168_v12 }
 0xb28   :  { %v1171_v18 = vand.u32 2147483647, %v1167_v15 }
 0xb29   :  { %v1176_v22 = vmax.f32 %v1172_v16, 1e-08  ;;  %v1158_v23 = vpop.xlane.xlu1 %1157  ;;  %v1156_v36 = vpop.xlane.xlu0 %1155 }
 0xb2a   :  { %v1175_v25 = vmax.f32 %v1171_v18, 1e-08  ;;  %v1170_v37 = vsub.f32 %v1158_v23, %v1166_v20  ;;  %v1169_v26 = vsub.f32 %v1156_v36, %v1165_v21 }
 0xb2b   :  { %1904 = vrsqrt.f32 %v1176_v22  ;;  %vm1188_vm6 = vcmp.eq.f32.partialorder %v1176_v22, inf  ;;  %v1191_v38 = vand.u32 2147483648, %v1176_v22  ;;  %vm1190_vm7 = vcmp.eq.f32.partialorder %v1176_v22, 0.0 }
 0xb2c   :  { %1906 = vrsqrt.f32 %v1175_v25  ;;  %v1174_v27 = vand.u32 2147483647, %v1170_v37  ;;  %v1173_v31 = vand.u32 2147483647, %v1169_v26  ;;  %vm1181_vm2 = vcmp.eq.f32.partialorder %v1175_v25, inf }
 0xb2d   :  { %v1184_v41 = vand.u32 2147483648, %v1175_v25  ;;  %vm1183_vm3 = vcmp.eq.f32.partialorder %v1175_v25, 0.0 }
 0xb2e   :  { %v1178_v32 = vmax.f32 %v1174_v27, 1e-08  ;;  %v1177_v34 = vmax.f32 %v1173_v31, 1e-08 }
 0xb30   :  { %1908 = vrsqrt.f32 %v1178_v32  ;;  %vm1202_vm4 = vcmp.eq.f32.partialorder %v1178_v32, inf  ;;  %v1205_v51 = vand.u32 2147483648, %v1178_v32  ;;  %vm1204_vm5 = vcmp.eq.f32.partialorder %v1178_v32, 0.0 }
 0xb31   :  { %1910 = vrsqrt.f32 %v1177_v34  ;;  %vm1195_vm8 = vcmp.eq.f32.partialorder %v1177_v34, inf  ;;  %v1198_v57 = vand.u32 2147483648, %v1177_v34  ;;  %vm1197_vm9 = vcmp.eq.f32.partialorder %v1177_v34, 0.0 }
 0xb35   :  { %v1905_v35 = vpop.eup %1904 }
 0xb36   :  { %v1907_v52 = vpop.eup %1906  ;;  %v1187_v56 = vmul.f32 %v1905_v35, %v1176_v22 }
 0xb37   :  { %v1180_v39 = vmul.f32 %v1907_v52, %v1175_v25 }
 0xb38   :  { %v1189_v40 = vsel %vm1188_vm6, %v1176_v22, %v1187_v56 }
 0xb39   :  { %v1192_v42 = vsel %vm1190_vm7, %v1191_v38, %v1189_v40  ;;  %v1182_v43 = vsel %vm1181_vm2, %v1175_v25, %v1180_v39 }
 0xb3a   :  { %1912 = vrcp.f32 %v1192_v42  ;;  %v1185_v44 = vsel %vm1183_vm3, %v1184_v41, %v1182_v43  ;;  %v1909_v47 = vpop.eup %1908 }
 0xb3b   :  { %1914 = vrcp.f32 %v1185_v44  ;;  %v1911_v50 = vpop.eup %1910  ;;  %v1201_v49 = vmul.f32 %v1909_v47, %v1178_v32 }
 0xb3c   :  { %v1194_v53 = vmul.f32 %v1911_v50, %v1177_v34 }
 0xb3d   :  { %v1203_v55 = vsel %vm1202_vm4, %v1178_v32, %v1201_v49 }
 0xb3e   :  { %v1206_v54 = vsel %vm1204_vm5, %v1205_v51, %v1203_v55  ;;  %v1196_v59 = vsel %vm1195_vm8, %v1177_v34, %v1194_v53 }
 0xb3f   :  { %1916 = vrcp.f32 %v1206_v54  ;;  %v1199_v60 = vsel %vm1197_vm9, %v1198_v57, %v1196_v59 }
 0xb40   :  { %1918 = vrcp.f32 %v1199_v60 }
 0xb44   :  { %v1913_v62 = vpop.eup %1912 }
 0xb45   :  { %v1915_v63 = vpop.eup %1914  ;;  %1218 = vperm.xlu1 %1744, %v1913_v62  }
 0xb46   :  { %1213 = vperm.xlu0 %1743, %v1915_v63  }
 0xb49   :  { %v1917_v4 = vpop.eup %1916 }
 0xb4a   :  { %v1919_v5 = vpop.eup %1918  ;;  %1228 = vperm.xlu0 %1743, %v1917_v4  }
 0xb4b   :  { %1223 = vperm.xlu1 %1744, %v1919_v5  }
 0xbc4   :  { %v1219_v58 = vpop.permute.xlu1 %1218 }
 0xbc5   :  { %v1232_v30 = vmul.f32 %v2402_v17, %v1219_v58  ;;  %v1214_v0 = vpop.permute.xlu0 %1213 }
 0xbc6   :  { %v1231_v3 = vmul.f32 %v1214_v0, %v2404_v24 }
 0xbc8   :  { %v1732_v10 = vpack.c.bf16 %v1232_v30, %v1231_v3 }
 0xbc9   :  { %v1229_v1 = vpop.permute.xlu0 %1228 }
 0xbca   :  { %1733 = vmatpush3.bf16.msra.mxu1 %v1732_v10  ;;  %v1224_v61 = vpop.permute.xlu1 %1223  ;;  %v1234_v19 = vmul.f32 %v2410_v28, %v1229_v1 }
 0xbcb   :  { %1734 = vmatprep.subr.bf16.mxu1 %v1963_v9  ;;  %v1233_v2 = vmul.f32 %v1224_v61, %v2412_v45 }
 0xbcd   :  { %v1735_v48 = vpack.c.bf16 %v1234_v19, %v1233_v2 }
 0xbcf   :  { %1736 = vmatpush3.bf16.msra.mxu1 %v1735_v48 }
 0xbd2   :  { %1625 = vmatmul.mubr.msk.f32.vlgmr.msra.gmra.mrb[12].mxu1 %vm620_vm14, %v1235_v13 }
 0xca5   :  { %v1305_v17 = vpop.f32.mrb[12].mxu1 }
 0xca6   :  { %v1626_v24 = vpop.f32.mrb[13].mxu1  ;;  %v1309_v6 = vmul.f32 %v1305_v17, %v1305_v17  ;;  %v1314_v7 = vmul.f32 2.0, %v1305_v17 }
 0xca8   :  { %v1311_v29 = vsel %vm1310_vm10, %v1309_v6, 0.0  ;;  %v1315_v28 = vmul.f32 %v1314_v7, %v1305_v17 }
 0xca9   :  { %1312 = vadd.xlane.f32.xlu1 %v1311_v29 }
 0xd36   :  { %v1313_v8 = vpop.xlane.xlu1 %1312 }
 0xd37   :  { %v1316_v9 = vsub.f32 %v1313_v8, %v1315_v28 }
 0xd39   :  { %v1317_v11 = vand.u32 2147483647, %v1316_v9 }
 0xd3b   :  { %v1318_v45 = vmax.f32 %v1317_v11, 1e-08 }
 0xd3d   :  { %1920 = vrsqrt.f32 %v1318_v45  ;;  %vm1321_vm11 = vcmp.eq.f32.partialorder %v1318_v45, inf  ;;  %v1324_v12 = vand.u32 2147483648, %v1318_v45  ;;  %vm1323_vm12 = vcmp.eq.f32.partialorder %v1318_v45, 0.0 }
 0xd47   :  { %v1921_v33 = vpop.eup %1920 }
 0xd48   :  { %v1320_v46 = vmul.f32 %v1921_v33, %v1318_v45 }
 0xd4a   :  { %v1322_v14 = vsel %vm1321_vm11, %v1318_v45, %v1320_v46 }
 0xd4b   :  { %v1325_v15 = vsel %vm1323_vm12, %v1324_v12, %v1322_v14 }
 0xd4c   :  { %1922 = vrcp.f32 %v1325_v15 }
 0xd56   :  { %v1923_v16 = vpop.eup %1922 }
 0xd57   :  { %1329 = vperm.xlu0 %1743, %v1923_v16  }
 0xdd6   :  { %v1330_v18 = vpop.permute.xlu0 %1329 }
 0xdd7   :  { %v1332_v20 = vmul.f32 %v1330_v18, %v1305_v17 }
 0xdd9   :  { %1333 = vst [vmem:[#allocation6] sm:$0x3] %v1332_v20 }
 0xdda   :  { %1947 = shalt.err (!%p1944_p9)
}
 0xddb   :  { %s1948_s12 = scalar_lea.hbm %s2456_s9, 32 }
 0xddc   :  { %p1949_p10 = scmp.ne.s32.totalorder %s2456_s9, %s1948_s12  ;;  %p1952_p11 = scmp.lt.u32.totalorder %s1948_s12, %s2456_s9 }
 0xdde   :  { %p1954_p12 = pnand %p1952_p11, %p1949_p10 }
 0xde0   :  { %1957 = shalt.err (!%p1954_p12)
}
 0xde1   :  { %1343 = dma.vmem_to_hbm [thread:$0]  %s1341_s29, 32, %s2456_s9, [#allocation4]  }
 0xde2   :  { %1960 = dma.done.wait [#allocation4], 32  }
 0xde3   :  { %1961 = vsyncadd [#allocation4], 4294967264 }
 0xde4   :  { %1347 = vsyncpa [#allocation4], 1 }
 0xde5   :  { %1348 = vsyncpa [#allocation5], 1 }

</bundles_post_ra>
